<compile_context>
chip_gen: v7x
topology: tpu7x:2x2x1
jax: 0.10.0
libtpu: 0.0.40
codegen_flags: <defaults>
</compile_context>

<pallas_src>
import jax
import jax.numpy as jnp
from jax.experimental import pallas as pl
from jax.experimental.pallas import tpu as pltpu


def _round_up(x, m):
    return ((x + m - 1) // m) * m


def attn_decoder_kernel(ids_ref,                               # (T,) int32 SMEM (prefetch)
                        emb_ref,                               # (1, H)   gathered embedding row
                        h0_ref, c0_ref,                        # (1, H)   initial state (resident)
                        enc_ref, enc_t_ref,                    # (S, H), (H, S) resident
                        wih_e_ref, wih_c_ref, whh_ref,         # (3, H, H) per-gate weights
                        bih_ref, bhh_ref,                      # (3, 1, H) per-gate biases
                        wout_h_ref, wout_c_ref, bout_ref,      # (H, Vp), (H, Vp), (1, Vp)
                        logp_ref, aux_ref,                     # (1, Vp), (1, AUX) per-step outputs
                        h_sc, c_sc):                           # (1, H) VMEM scratch (carried state)
    del ids_ref  # only consumed by the embedding-gather BlockSpec index_map
    H = h0_ref.shape[1]
    S = enc_ref.shape[0]
    t = pl.program_id(0)

    @pl.when(t == 0)
    def _():
        h_sc[...] = h0_ref[...]
        c_sc[...] = c0_ref[...]

    emb = emb_ref[...]          # (1, H)
    h = h_sc[...]               # (1, H)
    c = c_sc[...]               # (1, H)

    # ---- GRU cell, per-gate matmuls (PyTorch gate order r, z, n) ----
    def gates(g):
        gi = (jnp.dot(emb, wih_e_ref[g], preferred_element_type=jnp.float32)
              + jnp.dot(c, wih_c_ref[g], preferred_element_type=jnp.float32)
              + bih_ref[g])
        gh = jnp.dot(h, whh_ref[g], preferred_element_type=jnp.float32) + bhh_ref[g]
        return gi, gh

    i_r, h_r = gates(0)
    i_z, h_z = gates(1)
    i_n, h_n = gates(2)
    r = jax.nn.sigmoid(i_r + h_r)
    z = jax.nn.sigmoid(i_z + h_z)
    n = jnp.tanh(i_n + r * h_n)
    h_new = (1.0 - z) * n + z * h                     # (1, H) == rnn_output == new hidden

    # ---- Attention: energies = h_new @ enc^T  (enc^T passed pre-transposed) ----
    energies = jnp.dot(h_new, enc_t_ref[...], preferred_element_type=jnp.float32)  # (1, S)
    m = jnp.max(energies, axis=-1, keepdims=True)
    e = jnp.exp(energies - m)
    attn_w = e * pl.reciprocal(jnp.sum(e, axis=-1, keepdims=True), approx=False)   # (1, S)
    context = jnp.dot(attn_w, enc_ref[...], preferred_element_type=jnp.float32)    # (1, H)

    # ---- output = log_softmax(h @ Wout_h + ctx @ Wout_c + b)  at padded V ----
    logits = (jnp.dot(h_new, wout_h_ref[...], preferred_element_type=jnp.float32)
              + jnp.dot(context, wout_c_ref[...], preferred_element_type=jnp.float32)
              + bout_ref[...])                        # (1, Vp); padded cols = -1e30
    lmax = jnp.max(logits, axis=-1, keepdims=True)
    shifted = logits - lmax
    lse = jnp.log(jnp.sum(jnp.exp(shifted), axis=-1, keepdims=True))
    logp_ref[...] = shifted - lse

    # ---- pack small per-step outputs into one lane-dense slab ----
    pieces = [context, h_new, attn_w]
    pad = aux_ref.shape[1] - (2 * H + S)
    if pad:
        pieces.append(jnp.zeros((1, pad), jnp.float32))
    aux_ref[...] = jnp.concatenate(pieces, axis=1)

    # ---- carry recurrent state to the next grid step ----
    h_sc[...] = h_new
    c_sc[...] = context


def init_params(key, hidden_size, output_size):
    H, V = hidden_size, output_size
    ks = jax.random.split(key, 7)
    k = 1.0 / jnp.sqrt(jnp.float32(H))
    ko = 1.0 / jnp.sqrt(jnp.float32(2 * H))

    # raw (PyTorch-layout) parameters, used directly by the pure-JAX reference
    emb = jax.random.normal(ks[0], (V, H), jnp.float32)
    w_ih = jax.random.uniform(ks[1], (3 * H, 2 * H), jnp.float32, -k, k)
    w_hh = jax.random.uniform(ks[2], (3 * H, H), jnp.float32, -k, k)
    b_ih = jax.random.uniform(ks[3], (3 * H,), jnp.float32, -k, k)
    b_hh = jax.random.uniform(ks[4], (3 * H,), jnp.float32, -k, k)
    w_out = jax.random.uniform(ks[5], (V, 2 * H), jnp.float32, -ko, ko)
    b_out = jax.random.uniform(ks[6], (V,), jnp.float32, -ko, ko)
    # NOTE: the Attn('general') Linear(H, H) exists in the torch module but its
    # output is discarded by Attn.score, so it is intentionally unused.

    # kernel layout: per-gate / per-input-half splits (transposed), padded V
    wih_t = w_ih.T                                   # (2H, 3H)
    whh_t = w_hh.T                                   # (H, 3H)
    w_ih_e = jnp.stack([wih_t[0:H,     g * H:(g + 1) * H] for g in range(3)])   # (3,H,H)
    w_ih_c = jnp.stack([wih_t[H:2 * H, g * H:(g + 1) * H] for g in range(3)])   # (3,H,H)
    w_hh_g = jnp.stack([whh_t[:,       g * H:(g + 1) * H] for g in range(3)])   # (3,H,H)
    b_ih_g = jnp.stack([b_ih[g * H:(g + 1) * H].reshape(1, H) for g in range(3)])  # (3,1,H)
    b_hh_g = jnp.stack([b_hh[g * H:(g + 1) * H].reshape(1, H) for g in range(3)])  # (3,1,H)

    Vp = _round_up(V, 128)
    wout_t = w_out.T                                 # (2H, V)
    w_out_h = jnp.zeros((H, Vp), jnp.float32).at[:, :V].set(wout_t[0:H])
    w_out_c = jnp.zeros((H, Vp), jnp.float32).at[:, :V].set(wout_t[H:2 * H])
    b_out_p = jnp.full((1, Vp), -1e30, jnp.float32).at[0, :V].set(b_out)

    return dict(
        embedding=emb, w_ih=w_ih, w_hh=w_hh, b_ih=b_ih, b_hh=b_hh,
        w_out=w_out, b_out=b_out,
        w_ih_e=w_ih_e, w_ih_c=w_ih_c, w_hh_g=w_hh_g,
        b_ih_g=b_ih_g, b_hh_g=b_hh_g,
        w_out_h=w_out_h, w_out_c=w_out_c, b_out_p=b_out_p,
    )


def attn_decoder_decode(params, token_ids, last_context, last_hidden,
                        encoder_outputs):
    """Run T teacher-forced decoder steps in a single pallas_call.

    token_ids (T,) int32; last_context (1,H); last_hidden (1,1,H);
    encoder_outputs (S,1,H).
    Returns per-step (log_probs (T,V), context (T,H), hidden (T,H), attn (T,S)).
    """
    H = last_context.shape[1]
    S = encoder_outputs.shape[0]
    T = token_ids.shape[0]
    V = params["w_out"].shape[0]
    Vp = params["w_out_h"].shape[1]
    AUX = _round_up(2 * H + S, 128)

    emb3d = params["embedding"].reshape(V, 1, H)
    enc = encoder_outputs.reshape(S, H)
    enc_t = enc.T
    h0 = last_hidden.reshape(1, H)
    c0 = last_context.reshape(1, H)

    const2 = lambda t, ids: (0, 0)
    const3 = lambda t, ids: (0, 0, 0)
    in_specs = [
        pl.BlockSpec((None, 1, H), lambda t, ids: (ids[t], 0, 0)),  # embedding row gather
        pl.BlockSpec((1, H), const2),          # h0
        pl.BlockSpec((1, H), const2),          # c0
        pl.BlockSpec((S, H), const2),          # encoder outputs
        pl.BlockSpec((H, S), const2),          # encoder outputs, transposed
        pl.BlockSpec((3, H, H), const3),       # w_ih (embedding half, per gate)
        pl.BlockSpec((3, H, H), const3),       # w_ih (context half, per gate)
        pl.BlockSpec((3, H, H), const3),       # w_hh (per gate)
        pl.BlockSpec((3, 1, H), const3),       # b_ih (per gate)
        pl.BlockSpec((3, 1, H), const3),       # b_hh (per gate)
        pl.BlockSpec((H, Vp), const2),         # w_out (rnn_output half, padded)
        pl.BlockSpec((H, Vp), const2),         # w_out (context half, padded)
        pl.BlockSpec((1, Vp), const2),         # b_out (padded with -1e30)
    ]
    out_specs = (
        pl.BlockSpec((None, 1, Vp), lambda t, ids: (t, 0, 0)),   # log-probs slab
        pl.BlockSpec((None, 1, AUX), lambda t, ids: (t, 0, 0)),  # [ctx|hid|attn] slab
    )
    out_shape = (
        jax.ShapeDtypeStruct((T, 1, Vp), jnp.float32),
        jax.ShapeDtypeStruct((T, 1, AUX), jnp.float32),
    )

    logp, aux = pl.pallas_call(
        attn_decoder_kernel,
        out_shape=out_shape,
        grid_spec=pltpu.PrefetchScalarGridSpec(
            num_scalar_prefetch=1,
            grid=(T,),
            in_specs=in_specs,
            out_specs=out_specs,
            scratch_shapes=[pltpu.VMEM((1, H), jnp.float32),   # hidden carry
                            pltpu.VMEM((1, H), jnp.float32)],  # context carry
        ),
        compiler_params=pltpu.CompilerParams(
            dimension_semantics=("arbitrary",)),   # sequential recurrence
    )(token_ids.astype(jnp.int32), emb3d, h0, c0, enc, enc_t,
      params["w_ih_e"], params["w_ih_c"], params["w_hh_g"],
      params["b_ih_g"], params["b_hh_g"],
      params["w_out_h"], params["w_out_c"], params["b_out_p"])

    logp = logp[:, 0, :V]                    # (T, V)
    aux = aux[:, 0, :]
    contexts = aux[:, 0:H]                   # (T, H)
    hiddens = aux[:, H:2 * H]                # (T, H)
    attn_ws = aux[:, 2 * H:2 * H + S]        # (T, S)
    return logp, contexts, hiddens, attn_ws


def attn_decoder_forward(params, word_input, last_context, last_hidden,
                         encoder_outputs):
    """Single-step forward with the exact PyTorch module output shapes:
    output (1,V), context (1,H), hidden (1,1,H), attn_weights (1,1,S)."""
    H = last_context.shape[1]
    S = encoder_outputs.shape[0]
    token = jnp.reshape(word_input, (1,)).astype(jnp.int32)
    logp, ctx, hid, attn = attn_decoder_decode(
        params, token, last_context, last_hidden, encoder_outputs)
    return logp, ctx.reshape(1, H), hid.reshape(1, 1, H), attn.reshape(1, 1, S)


def reference_decode(params, token_ids, last_context, last_hidden,
                     encoder_outputs):
    """Pure-JAX reference: the PyTorch module applied step by step."""
    H = last_context.shape[1]
    S = encoder_outputs.shape[0]
    enc = encoder_outputs.reshape(S, H)
    h = last_hidden.reshape(1, H)
    c = last_context
    outs, ctxs, hids, attns = [], [], [], []
    for t in range(int(token_ids.shape[0])):
        emb = params["embedding"][token_ids[t]].reshape(1, H)
        x = jnp.concatenate([emb, c], axis=1)
        gi = x @ params["w_ih"].T + params["b_ih"]
        gh = h @ params["w_hh"].T + params["b_hh"]
        i_r, i_z, i_n = gi[:, :H], gi[:, H:2 * H], gi[:, 2 * H:]
        h_r, h_z, h_n = gh[:, :H], gh[:, H:2 * H], gh[:, 2 * H:]
        r = jax.nn.sigmoid(i_r + h_r)
        z = jax.nn.sigmoid(i_z + h_z)
        n = jnp.tanh(i_n + r * h_n)
        h = (1.0 - z) * n + z * h
        energies = h @ enc.T
        aw = jax.nn.softmax(energies, axis=-1)
        c = aw @ enc
        logits = jnp.concatenate([h, c], axis=1) @ params["w_out"].T + params["b_out"]
        outs.append(jax.nn.log_softmax(logits, axis=-1))
        ctxs.append(c)
        hids.append(h)
        attns.append(aw)
    return (jnp.concatenate(outs, axis=0), jnp.concatenate(ctxs, axis=0),
            jnp.concatenate(hids, axis=0), jnp.concatenate(attns, axis=0))


if __name__ == "__main__":
    hidden_size = 32     # H
    output_size = 50     # vocabulary size V
    seq_len = 8          # S (number of encoder outputs)
    num_steps = 6        # T decoded tokens, all fused into ONE pallas_call

    key = jax.random.PRNGKey(0)
    kp, k1, k2, k3, k4 = jax.random.split(key, 5)
    params = init_params(kp, hidden_size, output_size)

    token_ids = jax.random.randint(k4, (num_steps,), 0, output_size,
                                   dtype=jnp.int32)
    last_context = jax.random.normal(k1, (1, hidden_size), jnp.float32)
    last_hidden = jax.random.normal(k2, (1, 1, hidden_size), jnp.float32)
    encoder_outputs = jax.random.normal(k3, (seq_len, 1, hidden_size), jnp.float32)

    # fused multi-step decode vs. per-step pure-JAX reference
    outs = attn_decoder_decode(params, token_ids, last_context, last_hidden,
                               encoder_outputs)
    outs = jax.block_until_ready(outs)
    refs = reference_decode(params, token_ids, last_context, last_hidden,
                            encoder_outputs)
    for got, want in zip(outs, refs):
        assert got.shape == want.shape, (got.shape, want.shape)
        assert jnp.allclose(got, want, rtol=1e-3, atol=1e-4), \
            float(jnp.max(jnp.abs(got - want)))

    # single-step call keeps the exact PyTorch module output contract
    out1, ctx1, hid1, attn1 = jax.block_until_ready(
        attn_decoder_forward(params, token_ids[0:1], last_context, last_hidden,
                             encoder_outputs))
    assert out1.shape == (1, output_size)
    assert ctx1.shape == (1, hidden_size)
    assert hid1.shape == (1, 1, hidden_size)
    assert attn1.shape == (1, 1, seq_len)
    assert jnp.allclose(out1, refs[0][0:1], rtol=1e-3, atol=1e-4)

    print("KERNEL_OK")
</pallas_src>

<mosaic_0001>
module attributes {stable_mosaic.version = 11 : i64} {
  func.func @attn_decoder_kernel(%arg0: i32, %arg1: memref<6xi32, #tpu.memory_space<smem>>, %arg2: memref<1x1x32xf32, #tpu.memory_space<vmem>>, %arg3: memref<1x32xf32, #tpu.memory_space<vmem>>, %arg4: memref<1x32xf32, #tpu.memory_space<vmem>>, %arg5: memref<8x32xf32, #tpu.memory_space<vmem>>, %arg6: memref<32x8xf32, #tpu.memory_space<vmem>>, %arg7: memref<3x32x32xf32, #tpu.memory_space<vmem>>, %arg8: memref<3x32x32xf32, #tpu.memory_space<vmem>>, %arg9: memref<3x32x32xf32, #tpu.memory_space<vmem>>, %arg10: memref<3x1x32xf32, #tpu.memory_space<vmem>>, %arg11: memref<3x1x32xf32, #tpu.memory_space<vmem>>, %arg12: memref<32x128xf32, #tpu.memory_space<vmem>>, %arg13: memref<32x128xf32, #tpu.memory_space<vmem>>, %arg14: memref<1x128xf32, #tpu.memory_space<vmem>>, %arg15: memref<1x1x128xf32, #tpu.memory_space<vmem>>, %arg16: memref<1x1x128xf32, #tpu.memory_space<vmem>>, %arg17: memref<1x32xf32, #tpu.memory_space<vmem>>, %arg18: memref<1x32xf32, #tpu.memory_space<vmem>>) attributes {dimension_semantics = [#tpu.dimension_semantics<arbitrary>], iteration_bounds = array<i64: 6>, scalar_prefetch = 1 : i64, scratch_operands = 2 : i64, tpu.core_type = #tpu.core_type<tc>, window_params = [{transform_indices = @transform_0, window_bounds = array<i64: 1, 1, 32>}, {pipeline_mode = #tpu.pipeline_mode<synchronous>, transform_indices = @transform_1, window_bounds = array<i64: 1, 32>}, {pipeline_mode = #tpu.pipeline_mode<synchronous>, transform_indices = @transform_2, window_bounds = array<i64: 1, 32>}, {pipeline_mode = #tpu.pipeline_mode<synchronous>, transform_indices = @transform_3, window_bounds = array<i64: 8, 32>}, {pipeline_mode = #tpu.pipeline_mode<synchronous>, transform_indices = @transform_4, window_bounds = array<i64: 32, 8>}, {pipeline_mode = #tpu.pipeline_mode<synchronous>, transform_indices = @transform_5, window_bounds = array<i64: 3, 32, 32>}, {pipeline_mode = #tpu.pipeline_mode<synchronous>, transform_indices = @transform_6, window_bounds = array<i64: 3, 32, 32>}, {pipeline_mode = #tpu.pipeline_mode<synchronous>, transform_indices = @transform_7, window_bounds = array<i64: 3, 32, 32>}, {pipeline_mode = #tpu.pipeline_mode<synchronous>, transform_indices = @transform_8, window_bounds = array<i64: 3, 1, 32>}, {pipeline_mode = #tpu.pipeline_mode<synchronous>, transform_indices = @transform_9, window_bounds = array<i64: 3, 1, 32>}, {pipeline_mode = #tpu.pipeline_mode<synchronous>, transform_indices = @transform_10, window_bounds = array<i64: 32, 128>}, {pipeline_mode = #tpu.pipeline_mode<synchronous>, transform_indices = @transform_11, window_bounds = array<i64: 32, 128>}, {pipeline_mode = #tpu.pipeline_mode<synchronous>, transform_indices = @transform_12, window_bounds = array<i64: 1, 128>}, {transform_indices = @transform_13, window_bounds = array<i64: 1, 1, 128>}, {transform_indices = @transform_14, window_bounds = array<i64: 1, 1, 128>}]} {
    %c0_i32 = arith.constant 0 : i32
    %0 = arith.cmpi eq, %arg0, %c0_i32 : i32
    %1 = arith.extui %0 : i1 to i32
    %c0_i32_0 = arith.constant 0 : i32
    %2 = arith.cmpi ne, %1, %c0_i32_0 : i32
    scf.if %2 {
      %c0_90 = arith.constant 0 : index
      %c0_91 = arith.constant 0 : index
      %116 = vector.load %arg3[%c0_90, %c0_91] : memref<1x32xf32, #tpu.memory_space<vmem>>, vector<1x32xf32>
      %c0_92 = arith.constant 0 : index
      %c0_93 = arith.constant 0 : index
      %117 = vector.load %arg17[%c0_92, %c0_93] : memref<1x32xf32, #tpu.memory_space<vmem>>, vector<1x32xf32>
      tpu.vector_store %arg17[%c0_92, %c0_93], %116 {strides = array<i32>} : memref<1x32xf32, #tpu.memory_space<vmem>>, vector<1x32xf32>,
      %c0_94 = arith.constant 0 : index
      %c0_95 = arith.constant 0 : index
      %118 = vector.load %arg4[%c0_94, %c0_95] : memref<1x32xf32, #tpu.memory_space<vmem>>, vector<1x32xf32>
      %c0_96 = arith.constant 0 : index
      %c0_97 = arith.constant 0 : index
      %119 = vector.load %arg18[%c0_96, %c0_97] : memref<1x32xf32, #tpu.memory_space<vmem>>, vector<1x32xf32>
      tpu.vector_store %arg18[%c0_96, %c0_97], %118 {strides = array<i32>} : memref<1x32xf32, #tpu.memory_space<vmem>>, vector<1x32xf32>,
    } else {
    }
    %c0 = arith.constant 0 : index
    %c0_1 = arith.constant 0 : index
    %c0_2 = arith.constant 0 : index
    %3 = vector.load %arg2[%c0, %c0_1, %c0_2] : memref<1x1x32xf32, #tpu.memory_space<vmem>>, vector<1x1x32xf32>
    %4 = vector.shape_cast %3 : vector<1x1x32xf32> to vector<1x32xf32>
    %c0_3 = arith.constant 0 : index
    %c0_4 = arith.constant 0 : index
    %5 = vector.load %arg17[%c0_3, %c0_4] : memref<1x32xf32, #tpu.memory_space<vmem>>, vector<1x32xf32>
    %c0_5 = arith.constant 0 : index
    %c0_6 = arith.constant 0 : index
    %6 = vector.load %arg18[%c0_5, %c0_6] : memref<1x32xf32, #tpu.memory_space<vmem>>, vector<1x32xf32>
    %c0_7 = arith.constant 0 : index
    %c0_8 = arith.constant 0 : index
    %c0_9 = arith.constant 0 : index
    %7 = vector.load %arg7[%c0_7, %c0_8, %c0_9] : memref<3x32x32xf32, #tpu.memory_space<vmem>>, vector<1x32x32xf32>
    %8 = vector.shape_cast %7 : vector<1x32x32xf32> to vector<32x32xf32>
    %cst = arith.constant dense<0.000000e+00> : vector<1x32xf32>
    %9 = tpu.matmul %4, %8, %cst {dimension_numbers = #tpu.dot_dimension_numbers<[1], [0], [0], [1], [0, 0, 1, 1], [], []>} : vector<1x32xf32>, vector<32x32xf32>, vector<1x32xf32> -> vector<1x32xf32>
    %c0_10 = arith.constant 0 : index
    %c0_11 = arith.constant 0 : index
    %c0_12 = arith.constant 0 : index
    %10 = vector.load %arg8[%c0_10, %c0_11, %c0_12] : memref<3x32x32xf32, #tpu.memory_space<vmem>>, vector<1x32x32xf32>
    %11 = vector.shape_cast %10 : vector<1x32x32xf32> to vector<32x32xf32>
    %cst_13 = arith.constant dense<0.000000e+00> : vector<1x32xf32>
    %12 = tpu.matmul %6, %11, %cst_13 {dimension_numbers = #tpu.dot_dimension_numbers<[1], [0], [0], [1], [0, 0, 1, 1], [], []>} : vector<1x32xf32>, vector<32x32xf32>, vector<1x32xf32> -> vector<1x32xf32>
    %13 = arith.addf %9, %12 : vector<1x32xf32>
    %c0_14 = arith.constant 0 : index
    %c0_15 = arith.constant 0 : index
    %c0_16 = arith.constant 0 : index
    %14 = vector.load %arg10[%c0_14, %c0_15, %c0_16] : memref<3x1x32xf32, #tpu.memory_space<vmem>>, vector<1x1x32xf32>
    %15 = vector.shape_cast %14 : vector<1x1x32xf32> to vector<1x32xf32>
    %16 = arith.addf %13, %15 : vector<1x32xf32>
    %c0_17 = arith.constant 0 : index
    %c0_18 = arith.constant 0 : index
    %c0_19 = arith.constant 0 : index
    %17 = vector.load %arg9[%c0_17, %c0_18, %c0_19] : memref<3x32x32xf32, #tpu.memory_space<vmem>>, vector<1x32x32xf32>
    %18 = vector.shape_cast %17 : vector<1x32x32xf32> to vector<32x32xf32>
    %cst_20 = arith.constant dense<0.000000e+00> : vector<1x32xf32>
    %19 = tpu.matmul %5, %18, %cst_20 {dimension_numbers = #tpu.dot_dimension_numbers<[1], [0], [0], [1], [0, 0, 1, 1], [], []>} : vector<1x32xf32>, vector<32x32xf32>, vector<1x32xf32> -> vector<1x32xf32>
    %c0_21 = arith.constant 0 : index
    %c0_22 = arith.constant 0 : index
    %c0_23 = arith.constant 0 : index
    %20 = vector.load %arg11[%c0_21, %c0_22, %c0_23] : memref<3x1x32xf32, #tpu.memory_space<vmem>>, vector<1x1x32xf32>
    %21 = vector.shape_cast %20 : vector<1x1x32xf32> to vector<1x32xf32>
    %22 = arith.addf %19, %21 : vector<1x32xf32>
    %c1 = arith.constant 1 : index
    %c0_24 = arith.constant 0 : index
    %c0_25 = arith.constant 0 : index
    %23 = vector.load %arg7[%c1, %c0_24, %c0_25] : memref<3x32x32xf32, #tpu.memory_space<vmem>>, vector<1x32x32xf32>
    %24 = vector.shape_cast %23 : vector<1x32x32xf32> to vector<32x32xf32>
    %cst_26 = arith.constant dense<0.000000e+00> : vector<1x32xf32>
    %25 = tpu.matmul %4, %24, %cst_26 {dimension_numbers = #tpu.dot_dimension_numbers<[1], [0], [0], [1], [0, 0, 1, 1], [], []>} : vector<1x32xf32>, vector<32x32xf32>, vector<1x32xf32> -> vector<1x32xf32>
    %c1_27 = arith.constant 1 : index
    %c0_28 = arith.constant 0 : index
    %c0_29 = arith.constant 0 : index
    %26 = vector.load %arg8[%c1_27, %c0_28, %c0_29] : memref<3x32x32xf32, #tpu.memory_space<vmem>>, vector<1x32x32xf32>
    %27 = vector.shape_cast %26 : vector<1x32x32xf32> to vector<32x32xf32>
    %cst_30 = arith.constant dense<0.000000e+00> : vector<1x32xf32>
    %28 = tpu.matmul %6, %27, %cst_30 {dimension_numbers = #tpu.dot_dimension_numbers<[1], [0], [0], [1], [0, 0, 1, 1], [], []>} : vector<1x32xf32>, vector<32x32xf32>, vector<1x32xf32> -> vector<1x32xf32>
    %29 = arith.addf %25, %28 : vector<1x32xf32>
    %c1_31 = arith.constant 1 : index
    %c0_32 = arith.constant 0 : index
    %c0_33 = arith.constant 0 : index
    %30 = vector.load %arg10[%c1_31, %c0_32, %c0_33] : memref<3x1x32xf32, #tpu.memory_space<vmem>>, vector<1x1x32xf32>
    %31 = vector.shape_cast %30 : vector<1x1x32xf32> to vector<1x32xf32>
    %32 = arith.addf %29, %31 : vector<1x32xf32>
    %c1_34 = arith.constant 1 : index
    %c0_35 = arith.constant 0 : index
    %c0_36 = arith.constant 0 : index
    %33 = vector.load %arg9[%c1_34, %c0_35, %c0_36] : memref<3x32x32xf32, #tpu.memory_space<vmem>>, vector<1x32x32xf32>
    %34 = vector.shape_cast %33 : vector<1x32x32xf32> to vector<32x32xf32>
    %cst_37 = arith.constant dense<0.000000e+00> : vector<1x32xf32>
    %35 = tpu.matmul %5, %34, %cst_37 {dimension_numbers = #tpu.dot_dimension_numbers<[1], [0], [0], [1], [0, 0, 1, 1], [], []>} : vector<1x32xf32>, vector<32x32xf32>, vector<1x32xf32> -> vector<1x32xf32>
    %c1_38 = arith.constant 1 : index
    %c0_39 = arith.constant 0 : index
    %c0_40 = arith.constant 0 : index
    %36 = vector.load %arg11[%c1_38, %c0_39, %c0_40] : memref<3x1x32xf32, #tpu.memory_space<vmem>>, vector<1x1x32xf32>
    %37 = vector.shape_cast %36 : vector<1x1x32xf32> to vector<1x32xf32>
    %38 = arith.addf %35, %37 : vector<1x32xf32>
    %c2 = arith.constant 2 : index
    %c0_41 = arith.constant 0 : index
    %c0_42 = arith.constant 0 : index
    %39 = vector.load %arg7[%c2, %c0_41, %c0_42] : memref<3x32x32xf32, #tpu.memory_space<vmem>>, vector<1x32x32xf32>
    %40 = vector.shape_cast %39 : vector<1x32x32xf32> to vector<32x32xf32>
    %cst_43 = arith.constant dense<0.000000e+00> : vector<1x32xf32>
    %41 = tpu.matmul %4, %40, %cst_43 {dimension_numbers = #tpu.dot_dimension_numbers<[1], [0], [0], [1], [0, 0, 1, 1], [], []>} : vector<1x32xf32>, vector<32x32xf32>, vector<1x32xf32> -> vector<1x32xf32>
    %c2_44 = arith.constant 2 : index
    %c0_45 = arith.constant 0 : index
    %c0_46 = arith.constant 0 : index
    %42 = vector.load %arg8[%c2_44, %c0_45, %c0_46] : memref<3x32x32xf32, #tpu.memory_space<vmem>>, vector<1x32x32xf32>
    %43 = vector.shape_cast %42 : vector<1x32x32xf32> to vector<32x32xf32>
    %cst_47 = arith.constant dense<0.000000e+00> : vector<1x32xf32>
    %44 = tpu.matmul %6, %43, %cst_47 {dimension_numbers = #tpu.dot_dimension_numbers<[1], [0], [0], [1], [0, 0, 1, 1], [], []>} : vector<1x32xf32>, vector<32x32xf32>, vector<1x32xf32> -> vector<1x32xf32>
    %45 = arith.addf %41, %44 : vector<1x32xf32>
    %c2_48 = arith.constant 2 : index
    %c0_49 = arith.constant 0 : index
    %c0_50 = arith.constant 0 : index
    %46 = vector.load %arg10[%c2_48, %c0_49, %c0_50] : memref<3x1x32xf32, #tpu.memory_space<vmem>>, vector<1x1x32xf32>
    %47 = vector.shape_cast %46 : vector<1x1x32xf32> to vector<1x32xf32>
    %48 = arith.addf %45, %47 : vector<1x32xf32>
    %c2_51 = arith.constant 2 : index
    %c0_52 = arith.constant 0 : index
    %c0_53 = arith.constant 0 : index
    %49 = vector.load %arg9[%c2_51, %c0_52, %c0_53] : memref<3x32x32xf32, #tpu.memory_space<vmem>>, vector<1x32x32xf32>
    %50 = vector.shape_cast %49 : vector<1x32x32xf32> to vector<32x32xf32>
    %cst_54 = arith.constant dense<0.000000e+00> : vector<1x32xf32>
    %51 = tpu.matmul %5, %50, %cst_54 {dimension_numbers = #tpu.dot_dimension_numbers<[1], [0], [0], [1], [0, 0, 1, 1], [], []>} : vector<1x32xf32>, vector<32x32xf32>, vector<1x32xf32> -> vector<1x32xf32>
    %c2_55 = arith.constant 2 : index
    %c0_56 = arith.constant 0 : index
    %c0_57 = arith.constant 0 : index
    %52 = vector.load %arg11[%c2_55, %c0_56, %c0_57] : memref<3x1x32xf32, #tpu.memory_space<vmem>>, vector<1x1x32xf32>
    %53 = vector.shape_cast %52 : vector<1x1x32xf32> to vector<1x32xf32>
    %54 = arith.addf %51, %53 : vector<1x32xf32>
    %55 = arith.addf %16, %22 : vector<1x32xf32>
    %56 = arith.negf %55 : vector<1x32xf32>
    %57 = math.exp %56 : vector<1x32xf32>
    %cst_58 = arith.constant 1.000000e+00 : f32
    %58 = vector.broadcast %cst_58 : f32 to vector<1x32xf32>
    %59 = arith.addf %58, %57 : vector<1x32xf32>
    %60 = arith.divf %58, %59 : vector<1x32xf32>
    %61 = arith.addf %32, %38 : vector<1x32xf32>
    %62 = arith.negf %61 : vector<1x32xf32>
    %63 = math.exp %62 : vector<1x32xf32>
    %cst_59 = arith.constant 1.000000e+00 : f32
    %64 = vector.broadcast %cst_59 : f32 to vector<1x32xf32>
    %65 = arith.addf %64, %63 : vector<1x32xf32>
    %66 = arith.divf %64, %65 : vector<1x32xf32>
    %67 = arith.mulf %60, %54 : vector<1x32xf32>
    %68 = arith.addf %48, %67 : vector<1x32xf32>
    %69 = math.tanh %68 : vector<1x32xf32>
    %cst_60 = arith.constant 1.000000e+00 : f32
    %70 = vector.broadcast %cst_60 : f32 to vector<1x32xf32>
    %71 = arith.subf %70, %66 : vector<1x32xf32>
    %72 = arith.mulf %71, %69 : vector<1x32xf32>
    %73 = arith.mulf %66, %5 : vector<1x32xf32>
    %74 = arith.addf %72, %73 : vector<1x32xf32>
    %c0_61 = arith.constant 0 : index
    %c0_62 = arith.constant 0 : index
    %75 = vector.load %arg6[%c0_61, %c0_62] : memref<32x8xf32, #tpu.memory_space<vmem>>, vector<32x8xf32>
    %cst_63 = arith.constant dense<0.000000e+00> : vector<1x8xf32>
    %76 = tpu.matmul %74, %75, %cst_63 {dimension_numbers = #tpu.dot_dimension_numbers<[1], [0], [0], [1], [0, 0, 1, 1], [], []>} : vector<1x32xf32>, vector<32x8xf32>, vector<1x8xf32> -> vector<1x8xf32>
    %cst_64 = arith.constant dense<0xFF800000> : vector<1xf32>
    %77 = vector.multi_reduction <maximumf>, %76, %cst_64 [1] : vector<1x8xf32> to vector<1xf32>
    %78 = vector.shape_cast %77 : vector<1xf32> to vector<1x1xf32>
    %79 = vector.broadcast %78 : vector<1x1xf32> to vector<1x8xf32>
    %80 = arith.subf %76, %79 : vector<1x8xf32>
    %81 = math.exp %80 : vector<1x8xf32>
    %cst_65 = arith.constant dense<0.000000e+00> : vector<1xf32>
    %82 = vector.multi_reduction <add>, %81, %cst_65 [1] : vector<1x8xf32> to vector<1xf32>
    %83 = vector.shape_cast %82 : vector<1xf32> to vector<1x1xf32>
    %84 = tpu.reciprocal %83 : vector<1x1xf32> -> vector<1x1xf32>
    %85 = vector.broadcast %84 : vector<1x1xf32> to vector<1x8xf32>
    %86 = arith.mulf %81, %85 : vector<1x8xf32>
    %c0_66 = arith.constant 0 : index
    %c0_67 = arith.constant 0 : index
    %87 = vector.load %arg5[%c0_66, %c0_67] : memref<8x32xf32, #tpu.memory_space<vmem>>, vector<8x32xf32>
    %cst_68 = arith.constant dense<0.000000e+00> : vector<1x32xf32>
    %88 = tpu.matmul %86, %87, %cst_68 {dimension_numbers = #tpu.dot_dimension_numbers<[1], [0], [0], [1], [0, 0, 1, 1], [], []>} : vector<1x8xf32>, vector<8x32xf32>, vector<1x32xf32> -> vector<1x32xf32>
    %c0_69 = arith.constant 0 : index
    %c0_70 = arith.constant 0 : index
    %89 = vector.load %arg12[%c0_69, %c0_70] : memref<32x128xf32, #tpu.memory_space<vmem>>, vector<32x128xf32>
    %cst_71 = arith.constant dense<0.000000e+00> : vector<1x128xf32>
    %90 = tpu.matmul %74, %89, %cst_71 {dimension_numbers = #tpu.dot_dimension_numbers<[1], [0], [0], [1], [0, 0, 1, 1], [], []>} : vector<1x32xf32>, vector<32x128xf32>, vector<1x128xf32> -> vector<1x128xf32>
    %c0_72 = arith.constant 0 : index
    %c0_73 = arith.constant 0 : index
    %91 = vector.load %arg13[%c0_72, %c0_73] : memref<32x128xf32, #tpu.memory_space<vmem>>, vector<32x128xf32>
    %cst_74 = arith.constant dense<0.000000e+00> : vector<1x128xf32>
    %92 = tpu.matmul %88, %91, %cst_74 {dimension_numbers = #tpu.dot_dimension_numbers<[1], [0], [0], [1], [0, 0, 1, 1], [], []>} : vector<1x32xf32>, vector<32x128xf32>, vector<1x128xf32> -> vector<1x128xf32>
    %93 = arith.addf %90, %92 : vector<1x128xf32>
    %c0_75 = arith.constant 0 : index
    %c0_76 = arith.constant 0 : index
    %94 = vector.load %arg14[%c0_75, %c0_76] : memref<1x128xf32, #tpu.memory_space<vmem>>, vector<1x128xf32>
    %95 = arith.addf %93, %94 : vector<1x128xf32>
    %cst_77 = arith.constant dense<0xFF800000> : vector<1xf32>
    %96 = vector.multi_reduction <maximumf>, %95, %cst_77 [1] : vector<1x128xf32> to vector<1xf32>
    %97 = vector.shape_cast %96 : vector<1xf32> to vector<1x1xf32>
    %98 = vector.broadcast %97 : vector<1x1xf32> to vector<1x128xf32>
    %99 = arith.subf %95, %98 : vector<1x128xf32>
    %100 = math.exp %99 : vector<1x128xf32>
    %cst_78 = arith.constant dense<0.000000e+00> : vector<1xf32>
    %101 = vector.multi_reduction <add>, %100, %cst_78 [1] : vector<1x128xf32> to vector<1xf32>
    %102 = vector.shape_cast %101 : vector<1xf32> to vector<1x1xf32>
    %103 = math.log %102 : vector<1x1xf32>
    %104 = vector.broadcast %103 : vector<1x1xf32> to vector<1x128xf32>
    %105 = arith.subf %99, %104 : vector<1x128xf32>
    %c0_79 = arith.constant 0 : index
    %c0_80 = arith.constant 0 : index
    %c0_81 = arith.constant 0 : index
    %106 = vector.load %arg15[%c0_79, %c0_80, %c0_81] : memref<1x1x128xf32, #tpu.memory_space<vmem>>, vector<1x1x128xf32>
    %107 = vector.shape_cast %106 : vector<1x1x128xf32> to vector<1x128xf32>
    %108 = vector.shape_cast %105 : vector<1x128xf32> to vector<1x1x128xf32>
    tpu.vector_store %arg15[%c0_79, %c0_80, %c0_81], %108 {strides = array<i32>} : memref<1x1x128xf32, #tpu.memory_space<vmem>>, vector<1x1x128xf32>,
    %cst_82 = arith.constant 0.000000e+00 : f32
    %109 = vector.broadcast %cst_82 : f32 to vector<1x56xf32>
    %110 = tpu.concatenate %88, %74, %86, %109 in 1 : vector<1x32xf32>, vector<1x32xf32>, vector<1x8xf32>, vector<1x56xf32> -> vector<1x128xf32>
    %c0_83 = arith.constant 0 : index
    %c0_84 = arith.constant 0 : index
    %c0_85 = arith.constant 0 : index
    %111 = vector.load %arg16[%c0_83, %c0_84, %c0_85] : memref<1x1x128xf32, #tpu.memory_space<vmem>>, vector<1x1x128xf32>
    %112 = vector.shape_cast %111 : vector<1x1x128xf32> to vector<1x128xf32>
    %113 = vector.shape_cast %110 : vector<1x128xf32> to vector<1x1x128xf32>
    tpu.vector_store %arg16[%c0_83, %c0_84, %c0_85], %113 {strides = array<i32>} : memref<1x1x128xf32, #tpu.memory_space<vmem>>, vector<1x1x128xf32>,
    %c0_86 = arith.constant 0 : index
    %c0_87 = arith.constant 0 : index
    %114 = vector.load %arg17[%c0_86, %c0_87] : memref<1x32xf32, #tpu.memory_space<vmem>>, vector<1x32xf32>
    tpu.vector_store %arg17[%c0_86, %c0_87], %74 {strides = array<i32>} : memref<1x32xf32, #tpu.memory_space<vmem>>, vector<1x32xf32>,
    %c0_88 = arith.constant 0 : index
    %c0_89 = arith.constant 0 : index
    %115 = vector.load %arg18[%c0_88, %c0_89] : memref<1x32xf32, #tpu.memory_space<vmem>>, vector<1x32xf32>
    tpu.vector_store %arg18[%c0_88, %c0_89], %88 {strides = array<i32>} : memref<1x32xf32, #tpu.memory_space<vmem>>, vector<1x32xf32>,
    return
  }
  func.func @transform_0(%arg0: i32, %arg1: memref<6xi32, #tpu.memory_space<smem>>) -> (i32, i32, i32) {
    %0 = arith.index_cast %arg0 : i32 to index
    %1 = memref.load %arg1[%0] : memref<6xi32, #tpu.memory_space<smem>>
    %c0_i32 = arith.constant 0 : i32
    %c0_i32_0 = arith.constant 0 : i32
    %c0_i32_1 = arith.constant 0 : i32
    return %1, %c0_i32, %c0_i32_0 : i32, i32, i32
  }
  func.func @transform_1(%arg0: i32, %arg1: memref<6xi32, #tpu.memory_space<smem>>) -> (i32, i32) {
    %c0_i32 = arith.constant 0 : i32
    %c0_i32_0 = arith.constant 0 : i32
    %c0_i32_1 = arith.constant 0 : i32
    return %c0_i32, %c0_i32_0 : i32, i32
  }
  func.func @transform_2(%arg0: i32, %arg1: memref<6xi32, #tpu.memory_space<smem>>) -> (i32, i32) {
    %c0_i32 = arith.constant 0 : i32
    %c0_i32_0 = arith.constant 0 : i32
    %c0_i32_1 = arith.constant 0 : i32
    return %c0_i32, %c0_i32_0 : i32, i32
  }
  func.func @transform_3(%arg0: i32, %arg1: memref<6xi32, #tpu.memory_space<smem>>) -> (i32, i32) {
    %c0_i32 = arith.constant 0 : i32
    %c0_i32_0 = arith.constant 0 : i32
    %c0_i32_1 = arith.constant 0 : i32
    return %c0_i32, %c0_i32_0 : i32, i32
  }
  func.func @transform_4(%arg0: i32, %arg1: memref<6xi32, #tpu.memory_space<smem>>) -> (i32, i32) {
    %c0_i32 = arith.constant 0 : i32
    %c0_i32_0 = arith.constant 0 : i32
    %c0_i32_1 = arith.constant 0 : i32
    return %c0_i32, %c0_i32_0 : i32, i32
  }
  func.func @transform_5(%arg0: i32, %arg1: memref<6xi32, #tpu.memory_space<smem>>) -> (i32, i32, i32) {
    %c0_i32 = arith.constant 0 : i32
    %c0_i32_0 = arith.constant 0 : i32
    %c0_i32_1 = arith.constant 0 : i32
    %c0_i32_2 = arith.constant 0 : i32
    return %c0_i32, %c0_i32_0, %c0_i32_1 : i32, i32, i32
  }
  func.func @transform_6(%arg0: i32, %arg1: memref<6xi32, #tpu.memory_space<smem>>) -> (i32, i32, i32) {
    %c0_i32 = arith.constant 0 : i32
    %c0_i32_0 = arith.constant 0 : i32
    %c0_i32_1 = arith.constant 0 : i32
    %c0_i32_2 = arith.constant 0 : i32
    return %c0_i32, %c0_i32_0, %c0_i32_1 : i32, i32, i32
  }
  func.func @transform_7(%arg0: i32, %arg1: memref<6xi32, #tpu.memory_space<smem>>) -> (i32, i32, i32) {
    %c0_i32 = arith.constant 0 : i32
    %c0_i32_0 = arith.constant 0 : i32
    %c0_i32_1 = arith.constant 0 : i32
    %c0_i32_2 = arith.constant 0 : i32
    return %c0_i32, %c0_i32_0, %c0_i32_1 : i32, i32, i32
  }
  func.func @transform_8(%arg0: i32, %arg1: memref<6xi32, #tpu.memory_space<smem>>) -> (i32, i32, i32) {
    %c0_i32 = arith.constant 0 : i32
    %c0_i32_0 = arith.constant 0 : i32
    %c0_i32_1 = arith.constant 0 : i32
    %c0_i32_2 = arith.constant 0 : i32
    return %c0_i32, %c0_i32_0, %c0_i32_1 : i32, i32, i32
  }
  func.func @transform_9(%arg0: i32, %arg1: memref<6xi32, #tpu.memory_space<smem>>) -> (i32, i32, i32) {
    %c0_i32 = arith.constant 0 : i32
    %c0_i32_0 = arith.constant 0 : i32
    %c0_i32_1 = arith.constant 0 : i32
    %c0_i32_2 = arith.constant 0 : i32
    return %c0_i32, %c0_i32_0, %c0_i32_1 : i32, i32, i32
  }
  func.func @transform_10(%arg0: i32, %arg1: memref<6xi32, #tpu.memory_space<smem>>) -> (i32, i32) {
    %c0_i32 = arith.constant 0 : i32
    %c0_i32_0 = arith.constant 0 : i32
    %c0_i32_1 = arith.constant 0 : i32
    return %c0_i32, %c0_i32_0 : i32, i32
  }
  func.func @transform_11(%arg0: i32, %arg1: memref<6xi32, #tpu.memory_space<smem>>) -> (i32, i32) {
    %c0_i32 = arith.constant 0 : i32
    %c0_i32_0 = arith.constant 0 : i32
    %c0_i32_1 = arith.constant 0 : i32
    return %c0_i32, %c0_i32_0 : i32, i32
  }
  func.func @transform_12(%arg0: i32, %arg1: memref<6xi32, #tpu.memory_space<smem>>) -> (i32, i32) {
    %c0_i32 = arith.constant 0 : i32
    %c0_i32_0 = arith.constant 0 : i32
    %c0_i32_1 = arith.constant 0 : i32
    return %c0_i32, %c0_i32_0 : i32, i32
  }
  func.func @transform_13(%arg0: i32, %arg1: memref<6xi32, #tpu.memory_space<smem>>) -> (i32, i32, i32) {
    %c0_i32 = arith.constant 0 : i32
    %c0_i32_0 = arith.constant 0 : i32
    %c0_i32_1 = arith.constant 0 : i32
    return %arg0, %c0_i32, %c0_i32_0 : i32, i32, i32
  }
  func.func @transform_14(%arg0: i32, %arg1: memref<6xi32, #tpu.memory_space<smem>>) -> (i32, i32, i32) {
    %c0_i32 = arith.constant 0 : i32
    %c0_i32_0 = arith.constant 0 : i32
    %c0_i32_1 = arith.constant 0 : i32
    return %arg0, %c0_i32, %c0_i32_0 : i32, i32, i32
  }
}

</mosaic_0001>

<bundles_post_ra>
// kernel: tpu_custom_call.1
= control target key start
LH: loop header
LB: loop body
LE: loop exit
PB: predicated region body
PF: predicated region fallthrough
CT: control target
= control target key end

     0   :  { %s3149_s0 = inlined_call_operand.hbm [shape: s32[6], index: 0, kind: input, shape index: {}]   ;;  %s3150_s1 = inlined_call_operand.vmem [shape: f32[50,1,32], index: 1, kind: input, shape index: {}]   ;;  %s3151_s2 = inlined_call_operand.hbm [shape: f32[1,32], index: 2, kind: input, shape index: {}]   ;;  %s3152_s3 = inlined_call_operand.hbm [shape: f32[1,32], index: 3, kind: input, shape index: {}]   ;;  %s3153_s4 = inlined_call_operand.hbm [shape: f32[8,32], index: 4, kind: input, shape index: {}]   ;;  %s3154_s5 = inlined_call_operand.vmem [shape: f32[32,8], index: 5, kind: input, shape index: {}]   ;;  %s3155_s6 = inlined_call_operand.vmem [shape: f32[3,32,32], index: 6, kind: input, shape index: {}]   ;;  %s3156_s7 = inlined_call_operand.hbm [shape: f32[3,32,32], index: 7, kind: input, shape index: {}]   ;;  %s3157_s8 = inlined_call_operand.hbm [shape: f32[3,32,32], index: 8, kind: input, shape index: {}]   ;;  %s3158_s9 = inlined_call_operand.vmem [shape: f32[3,1,32], index: 9, kind: input, shape index: {}]   ;;  %s3159_s10 = inlined_call_operand.hbm [shape: f32[3,1,32], index: 10, kind: input, shape index: {}]   ;;  %s3160_s11 = inlined_call_operand.vmem [shape: f32[32,128], index: 11, kind: input, shape index: {}]   ;;  %s3161_s12 = inlined_call_operand.vmem [shape: f32[32,128], index: 12, kind: input, shape index: {}]   ;;  %s3162_s13 = inlined_call_operand.vmem [shape: f32[1,128], index: 13, kind: input, shape index: {}]   ;;  %s3163_s14 = inlined_call_operand.hbm [shape: f32[6,1,128], index: 14, kind: output, shape index: {0}]   ;;  %s3164_s15 = inlined_call_operand.hbm [shape: f32[6,1,128], index: 15, kind: output, shape index: {1}]  }
   0x1   :  { %3178 = sst [smem:[#allocation33_spill]] %s3151_s2  ;;  %s2269_s20 = scalar_lea.hbm %s3149_s0, 16 }
   0x2   :  { %3179 = sst [smem:[#allocation34_spill]] %s3152_s3  ;;  %p2270_p0 = scmp.ne.s32.totalorder %s3149_s0, %s2269_s20 }
   0x3   :  { %3180 = sst [smem:[#allocation35_spill]] %s3163_s14  ;;  %p2273_p1 = scmp.lt.u32.totalorder %s2269_s20, %s3149_s0 }
   0x4   :  { %3181 = sst [smem:[#allocation36_spill]] %s3164_s15 }
   0x5   :  { %p2275_p2 = pnand %p2273_p1, %p2270_p0 }
   0x7   :  { %2278 = shalt.err (!%p2275_p2)  }
   0x8   :  { %s2561_s25 = smov [#allocation5]  }
   0x9   :  { %22 = dma.hbm_to_smem %s3149_s0, 16, %s2561_s25, [#allocation4] }
   0xa   :  { %2519 = dma.done.wait [#allocation4], 16 }
   0xb   :  { %2520 = vsyncadd [#allocation4], 4294967280 }
   0xc   :  { %24 = sfence }
   0xd   :  { %25 = vsyncpa [#allocation7], 0 }
   0xe   :  { %26 = vsyncpa [#allocation10], 0 }
   0xf   :  { %27 = vsyncpa [#allocation13], 0 }
  0x10   :  { %28 = vsyncpa [#allocation16], 0 }
  0x11   :  { %29 = vsyncpa [#allocation8], 0 }
  0x12   :  { %31 = vsyncpa [#allocation8 + $0x1], 0 }
  0x13   :  { %32 = vsyncpa [#allocation19], 0 }
  0x14   :  { %34 = vsyncpa [#allocation19 + $0x1], 0  ;;  %s2671_s28 = smov 0   ;;  %s2673_s29 = smov 0  }
  0x15   :  { %s2675_s30 = smov 0   ;;  %s2677_s16 = smov 0  }
  0x16 LB: > { %3182 = sst [smem:[#allocation27_spill]] %s2547_s28  ;;  %s2692_s0 = sadd.s32 4294967295, %s2559_s16   ;;  %s2559_s16 = sphi %s2677_s16, %s3214_s16   ;;  %s2555_s30 = sphi %s2675_s30, %s3216_s30   ;;  %s2551_s29 = sphi %s2673_s29, %s3218_s29   ;;  %s2547_s28 = sphi %s2671_s28, %s3217_s28  }
  0x17   : > { %3183 = sst [smem:[#allocation28_spill]] %s2555_s30  ;;  %s1807_s17 = sadd.s32 4294967294, %s2559_s16  }
  0x18   : > { %3184 = sst [smem:[#allocation29_spill]] %s2559_s16  ;;  %s2696_s18 = sadd.s32 1, %s2559_s16  }
  0x19   : > { %3185 = sst [smem:[#allocation30_spill]] %s2696_s18  ;;  %s327_s19 = sadd.s32 1, %s2555_s30 }
  0x1a   : > { %s324_s20 = ssub.s32 %s2559_s16, %s2696_s18  ;;  %p337_p3 = scmp.ne.s32.totalorder %s2555_s30, %s2551_s29 }
  0x1b   : > { %p325_p4 = scmp.eq.s32.totalorder %s324_s20, 0  ;;  %p338_p5 = scmp.eq.s32.totalorder %s2692_s0, 5 }
  0x1c   : > { %p343_p6 = scmp.ne.s32.totalorder %s2551_s29, %s2547_s28  ;;  %p344_p7 = scmp.eq.s32.totalorder %s1807_s17, 5 }
  0x1d   : > { %s2707_s21 = scalar_select %p325_p4, %s2555_s30, %s327_s19  }
  0x1e   : > { %p2709_p8 = por %p338_p5, %p337_p3  ;;  %p2713_p9 = por %p344_p7, %p343_p6 }
  0x1f   : > { %3186 = sst [smem:[#allocation31_spill]] %s2707_s21  ;;  %p1808_p10 = scmp.ge.s32.totalorder %s2559_s16, 1 }
  0x20   : > { %s3187_s22 = scalar_select %p2709_p8, 1, 0 }
  0x21   : > { %s3188_s23 = scalar_select %p2713_p9, 1, 0 }
  0x22   : > { %p377_p11 = scmp.lt.s32.totalorder %s2559_s16, 7  ;;  %p3171_p13 = scmp.eq.s32.totalorder %s2692_s0, 0 }
  0x23   : > { %3189 = sst [smem:[#allocation32_spill]] %s3188_s23  ;;  %s2562_s25 = smov [#allocation9]  }
  0x24   : > { %p2721_p0 = pnand %p1808_p10, %p377_p11  ;;  %s401_s26 = sshll.u32 %s2562_s25, 4  ;;  %s402_s26 = int_to_ptr.vmem [resolvable:$true] %s401_s26 }
  0x25   : > { %s2563_s27 = smov [#allocation12]   ;;  %s2564_s20 = smov [#allocation6]  }
  0x26   : > { %s3190_s24 = scalar_select %p2721_p0, 1, 0 }
  0x27   : > { %p2164_p1 = pneg %p2721_p0  ;;  %s428_s17 = sshll.u32 %s2563_s27, 4  ;;  %s2733_s17 = int_to_ptr.vmem [resolvable:$true] %s428_s17 }
  0x28   : > { %s2735_s21 = sshll.u32 %s2564_s20, 4  ;;  %s3192_s3 = sld [smem:[#allocation34_spill]]  ;;  %s391_s21 = int_to_ptr.vmem [resolvable:$true] %s2735_s21 }
  0x29   : > { %p2729_p2 = pnand %p3171_p13, %p2164_p1 }
  0x2b   : > { %p2745_p4 = pneg %p2729_p2 }
  0x2e   : > { %s2279_s25 = scalar_lea.hbm %s3192_s3, 16 }
  0x2f   : > { %p2280_p3 = scmp.ne.s32.totalorder %s3192_s3, %s2279_s25  ;;  %p2286_p7 = scmp.lt.u32.totalorder %s2279_s25, %s3192_s3 }
  0x31   : > { %p2282_p5 = pnand %p2745_p4, %p2280_p3 }
  0x33   : > { %p2283_p6 = pneg %p2282_p5 }
  0x35   : > { %p2288_p10 = pnand %p2286_p7, %p2283_p6 }
  0x37   : > { %2291 = shalt.err (!%p2288_p10)
}
  0x38   : > { %s2292_s30 = scalar_lea.vmem %s402_s26, 16  ;;  %s2299_s28 = scalar_lea.vmem %s402_s26, 32 }
  0x39   : > { %p2293_p11 = scmp.ne.s32.totalorder %s402_s26, %s2292_s30  ;;  %p2300_p13 = scmp.lt.s32.totalorder %s402_s26, %s402_s26 }
  0x3a   : > { %p2301_p9 = scmp.lt.s32.totalorder %s2299_s28, %s2292_s30 }
  0x3b   : > { %p2295_p1 = pnand %p2293_p11, %p2745_p4 }
  0x3c   : > { %p2302_p8 = por %p2301_p9, %p2300_p13 }
  0x3d   : > { %p2296_p12 = pneg %p2295_p1 }
  0x3f   : > { %p2303_p0 = pnand %p2302_p8, %p2296_p12 }
  0x41   : > { %2306 = shalt.err (!%p2303_p0)
}
  0x42   : > { %2170 = dma.hbm_to_vmem [thread:$0]  (!%p2729_p2), %s3192_s3, 16, %s402_s26, [#allocation10]  }
  0x43   : > { %s2307_s20 = scalar_lea.hbm %s3156_s7, 1536 }
  0x44   : > { %p2308_p3 = scmp.ne.s32.totalorder %s3156_s7, %s2307_s20  ;;  %p2314_p8 = scmp.lt.u32.totalorder %s2307_s20, %s3156_s7 }
  0x46   : > { %p2310_p5 = pnand %p2308_p3, %p2745_p4 }
  0x48   : > { %p2311_p9 = pneg %p2310_p5 }
  0x4a   : > { %p2316_p12 = pnand %p2314_p8, %p2311_p9 }
  0x4c   : > { %2319 = shalt.err (!%p2316_p12)
}
  0x4d   : > { %s2320_s26 = scalar_lea.vmem %s2733_s17, 1536  ;;  %p2328_p7 = scmp.lt.s32.totalorder %s2733_s17, %s2733_s17 }
  0x4e   : > { %p2321_p13 = scmp.ne.s32.totalorder %s2733_s17, %s2320_s26  ;;  %p2329_p10 = scmp.lt.s32.totalorder %s2320_s26, %s2320_s26 }
  0x50   : > { %p2323_p0 = pnand %p2321_p13, %p2745_p4  ;;  %p2330_p11 = por %p2329_p10, %p2328_p7 }
  0x52   : > { %p2324_p6 = pneg %p2323_p0 }
  0x54   : > { %p2331_p1 = pnand %p2330_p11, %p2324_p6 }
  0x56   : > { %2334 = shalt.err (!%p2331_p1)
}
  0x57   : > { %s3176_s14 = smov 128   ;;  %s3177_s15 = smov 8  }
  0x58   : > { %2176 = dma.hbm_to_vmem [thread:$0]  (!%p2729_p2), %s3156_s7, 1536, %s2733_s17, [#allocation13], %s3176_s14, %s3176_s14, %s3177_s15  }
  0x59   : > { %s3194_s2 = sld [smem:[#allocation33_spill]] }
  0x5f   : > { %s2335_s20 = scalar_lea.hbm %s3194_s2, 16 }
  0x60   : > { %p2336_p3 = scmp.ne.s32.totalorder %s3194_s2, %s2335_s20  ;;  %p2342_p8 = scmp.lt.u32.totalorder %s2335_s20, %s3194_s2 }
  0x62   : > { %p2338_p5 = pnand %p2336_p3, %p2745_p4 }
  0x64   : > { %p2339_p9 = pneg %p2338_p5 }
  0x66   : > { %p2344_p12 = pnand %p2342_p8, %p2339_p9 }
  0x68   : > { %2347 = shalt.err (!%p2344_p12)
}
  0x69   : > { %s2348_s18 = scalar_lea.vmem %s391_s21, 16  ;;  %s2355_s17 = scalar_lea.vmem %s391_s21, 32 }
  0x6a   : > { %p2349_p13 = scmp.ne.s32.totalorder %s391_s21, %s2348_s18  ;;  %p2356_p7 = scmp.lt.s32.totalorder %s391_s21, %s391_s21 }
  0x6b   : > { %p2357_p10 = scmp.lt.s32.totalorder %s2355_s17, %s2348_s18 }
  0x6c   : > { %p2351_p0 = pnand %p2349_p13, %p2745_p4 }
  0x6d   : > { %p2358_p11 = por %p2357_p10, %p2356_p7 }
  0x6e   : > { %p2352_p6 = pneg %p2351_p0 }
  0x70   : > { %p2359_p1 = pnand %p2358_p11, %p2352_p6 }
  0x72   : > { %2362 = shalt.err (!%p2359_p1)
}
  0x73   : > { %2167 = dma.hbm_to_vmem [thread:$0]  (!%p2729_p2), %s3194_s2, 16, %s391_s21, [#allocation7]  }
  0x74   : > { %s2567_s3 = smov [#allocation11]   ;;  %s2568_s20 = smov [#allocation14]  }
  0x75   : > { %s412_s25 = sshll.u32 %s2567_s3, 4  ;;  %s441_s30 = sshll.u32 %s2568_s20, 4  ;;  %s413_s25 = int_to_ptr.vmem [resolvable:$true] %s412_s25  ;;  %s442_s30 = int_to_ptr.vmem [resolvable:$true] %s441_s30 }
  0x76   : > { %s2363_s14 = scalar_lea.hbm %s3153_s4, 128 }
  0x77   : > { %p2364_p3 = scmp.ne.s32.totalorder %s3153_s4, %s2363_s14  ;;  %p2370_p8 = scmp.lt.u32.totalorder %s2363_s14, %s3153_s4 }
  0x79   : > { %p2366_p5 = pnand %p2364_p3, %p2745_p4 }
  0x7b   : > { %p2367_p9 = pneg %p2366_p5 }
  0x7d   : > { %p2372_p12 = pnand %p2370_p8, %p2367_p9 }
  0x7f   : > { %2375 = shalt.err (!%p2372_p12)
}
  0x80   : > { %s2376_s21 = scalar_lea.vmem %s413_s25, 128  ;;  %p2384_p7 = scmp.lt.s32.totalorder %s413_s25, %s413_s25 }
  0x81   : > { %p2377_p13 = scmp.ne.s32.totalorder %s413_s25, %s2376_s21  ;;  %p2385_p10 = scmp.lt.s32.totalorder %s2376_s21, %s2376_s21 }
  0x83   : > { %p2379_p0 = pnand %p2377_p13, %p2745_p4  ;;  %p2386_p11 = por %p2385_p10, %p2384_p7 }
  0x85   : > { %p2380_p6 = pneg %p2379_p0 }
  0x87   : > { %p2387_p1 = pnand %p2386_p11, %p2380_p6 }
  0x89   : > { %2390 = shalt.err (!%p2387_p1)
}
  0x8a   : > { %2173 = dma.hbm_to_vmem [thread:$0]  (!%p2729_p2), %s3153_s4, 128, %s413_s25, [#allocation10]  }
  0x8b   : > { %s2391_s20 = scalar_lea.hbm %s3157_s8, 1536 }
  0x8c   : > { %p2392_p3 = scmp.ne.s32.totalorder %s3157_s8, %s2391_s20  ;;  %p2398_p8 = scmp.lt.u32.totalorder %s2391_s20, %s3157_s8 }
  0x8e   : > { %p2394_p5 = pnand %p2392_p3, %p2745_p4 }
  0x90   : > { %p2395_p9 = pneg %p2394_p5 }
  0x92   : > { %p2400_p12 = pnand %p2398_p8, %p2395_p9 }
  0x94   : > { %2403 = shalt.err (!%p2400_p12)
}
  0x95   : > { %s2404_s23 = scalar_lea.vmem %s442_s30, 1536  ;;  %p2412_p7 = scmp.lt.s32.totalorder %s442_s30, %s442_s30 }
  0x96   : > { %p2405_p13 = scmp.ne.s32.totalorder %s442_s30, %s2404_s23  ;;  %p2413_p10 = scmp.lt.s32.totalorder %s2404_s23, %s2404_s23 }
  0x98   : > { %p2407_p0 = pnand %p2405_p13, %p2745_p4  ;;  %p2414_p11 = por %p2413_p10, %p2412_p7 }
  0x9a   : > { %p2408_p6 = pneg %p2407_p0 }
  0x9c   : > { %p2415_p1 = pnand %p2414_p11, %p2408_p6 }
  0x9e   : > { %2418 = shalt.err (!%p2415_p1)
}
  0x9f   : > { %s3195_s25 = smov 8   ;;  %s3196_s21 = smov 128  }
  0xa0   : > { %2179 = dma.hbm_to_vmem [thread:$0]  (!%p2729_p2), %s3157_s8, 1536, %s442_s30, [#allocation13], %s3196_s21, %s3196_s21, %s3195_s25  }
  0xa1   : > { %s2569_s14 = smov [#allocation15]   ;;  %s2419_s26 = scalar_lea.hbm %s3159_s10, 48 }
  0xa2   : > { %s457_s15 = sshll.u32 %s2569_s14, 4  ;;  %p2420_p3 = scmp.ne.s32.totalorder %s3159_s10, %s2419_s26  ;;  %s458_s15 = int_to_ptr.vmem [resolvable:$true] %s457_s15 }
  0xa3   : > { %p2426_p8 = scmp.lt.u32.totalorder %s2419_s26, %s3159_s10 }
  0xa4   : > { %p2422_p5 = pnand %p2420_p3, %p2745_p4 }
  0xa6   : > { %p2423_p9 = pneg %p2422_p5 }
  0xa8   : > { %p2428_p12 = pnand %p2426_p8, %p2423_p9 }
  0xaa   : > { %2431 = shalt.err (!%p2428_p12)
}
  0xab   : > { %s2432_s30 = scalar_lea.vmem %s458_s15, 48  ;;  %s2439_s25 = scalar_lea.vmem %s458_s15, 64 }
  0xac   : > { %p2433_p13 = scmp.ne.s32.totalorder %s458_s15, %s2432_s30  ;;  %p2440_p7 = scmp.lt.s32.totalorder %s458_s15, %s458_s15 }
  0xad   : > { %p2441_p10 = scmp.lt.s32.totalorder %s2439_s25, %s2432_s30 }
  0xae   : > { %p2435_p0 = pnand %p2433_p13, %p2745_p4 }
  0xaf   : > { %p2442_p11 = por %p2441_p10, %p2440_p7 }
  0xb0   : > { %p2436_p6 = pneg %p2435_p0 }
  0xb2   : > { %p2443_p1 = pnand %p2442_p11, %p2436_p6 }
  0xb4   : > { %2446 = shalt.err (!%p2443_p1)
}
  0xb5   : > { %s2570_s21 = smov 16   ;;  %s2571_s16 = smov 1  }
  0xb6   : > { %2182 = dma.hbm_to_vmem [thread:$0]  (!%p2729_p2), %s3159_s10, 48, %s458_s15, [#allocation16], %s2570_s21, %s2570_s21, %s2571_s16  }
  0xb7   : > { %p3197_p3 = scmp.ne.s32.totalorder %s3190_s24, 0 }
  0xb8   : > { %p3198_p4 = scmp.eq.s32.totalorder (!%p3197_p3), %s2692_s0, 0 }
  0xb9   : > { %490 = sbr.rel (%p3197_p3) target bundleno = 1798 (0x706), region = 72 }
  0xc0   : > { %2522 = dma.done.wait (%p3198_p4), [#allocation7], 16   ;;  %p3199_p5 = pmov %p3198_p4 }
  0xc1   : > { %p3200_p9 = pmov %p3198_p4 }
  0xc2   : > { %2524 = vsyncadd (%p3199_p5), [#allocation7], 4294967280 }
  0xc3   : > { %2526 = dma.done.wait (%p3200_p9), [#allocation10], 144   ;;  %p3201_p8 = pmov %p3198_p4 }
  0xc4   : > { %p3202_p12 = pmov %p3198_p4 }
  0xc5   : > { %2528 = vsyncadd (%p3201_p8), [#allocation10], 4294967152 }
  0xc6   : > { %2530 = dma.done.wait (%p3202_p12), [#allocation13], 3072   ;;  %p3203_p2 = pmov %p3198_p4 }
  0xc8   : > { %2532 = vsyncadd (%p3203_p2), [#allocation13], 4294964224  ;;  %p3204_p13 = pmov %p3203_p2 }
  0xc9   : > { %p3205_p0 = pmov %p3203_p2 }
  0xca   : > { %2534 = dma.done.wait (%p3204_p13), [#allocation16], 48  }
  0xcb   : > { %2536 = vsyncadd (%p3205_p0), [#allocation16], 4294967248  ;;  %s2882_s24 = sand.u32 1, %s2551_s29   ;;  %s558_s19 = sld [smem:[#allocation5 + %s2692_s0]] }
  0xcc   : > { %s551_s20 = scalar_lea.vmem [#allocation17], %s2882_s24  ;;  %s557_s28 = scalar_lea.vmem [#allocation18], %s2882_s24 }
  0xcd   : > { %p3206_p7 = scmp.ne.s32.totalorder %s2692_s0, 0 }
  0xce   : > { %v567_v0 = vld [vmem:[#allocation6] sm:$0x1] (!%p3206_p7)  ;;  %vm568_vm0 = vcmask (!%p3206_p7), 253952   ;;  %v570_v1 = vld [vmem:[#allocation9] sm:$0x1] (!%p3206_p7) }
  0xcf   : > { %566 = sbr.rel (%p3206_p7) target bundleno = 214 (0xd6), region = 100  ;;  %569 = vst.msk [vmem:[#allocation2] sm:$0x1] (!%p3206_p7), %vm568_vm0, %v567_v0  ;;  %571 = vst.msk [vmem:[#allocation3] sm:$0x1] (!%p3206_p7), %vm568_vm0, %v570_v1 }
  0xd1   : > { %p559_p6 = scmp.lt.s32.totalorder %s558_s19, 49 }
  0xd3   : > { %s3220_s19 = smov (!%p559_p6, %s558_s19), 49 }
  0xd4   : > { %s561_s15 = scalar_lea.vmem %s3150_s1, %s3220_s19 }
  0xd6 PF: > { %v579_v2 = vld [vmem:[#allocation12] sm:$0xff]  ;;  %v580_v3 = vld [vmem:[#allocation12 + $0x8] sm:$0xff]  ;;  %v2572_v5 = vmov 0.0|0.0   ;;  %v581_v8 = vld [vmem:[#allocation12 + $0x10] sm:$0xff]  ;;  %vm2573_vm1 = vmmov 0   ;;  %v2574_v13 = vmov 0.0  }
  0xd7   : > { %v816_v4 = vld [vmem:[#allocation12 + $0x20] sm:$0xff]  ;;  %2052 = vmatprep.subr.bf16.mxu0 %v2572_v5  ;;  %2070 = vmatprep.subr.bf16.mxu1 %v2572_v5  ;;  %v2053_v6 = vpack.c.bf16 %v580_v3, %v579_v2  ;;  %v817_v7 = vld [vmem:[#allocation12 + $0x28] sm:$0xff]  ;;  %v582_v9 = vld [vmem:[#allocation12 + $0x18] sm:$0xff]  ;;  %vm583_vm2 = vcmask 261120   ;;  %vm1634_vm3 = vcmask 253952   ;;  %vm1368_vm4 = vcmask 57344  }
  0xd8   : > { %v2071_v10 = vpack.c.bf16 %v817_v7, %v816_v4  ;;  %v818_v11 = vld [vmem:[#allocation12 + $0x30] sm:$0xff]  ;;  %v819_v12 = vld [vmem:[#allocation12 + $0x38] sm:$0xff]  ;;  %1923 = vmatprep.mubr.msk.f32.mxu0 %vm2573_vm1, %v2574_v13  ;;  %1956 = vmatprep.mubr.msk.f32.mxu1 %vm2573_vm1, %v2574_v13  ;;  %v2056_v14 = vpack.c.bf16 %v582_v9, %v581_v8  ;;  %v577_v23 = vld [vmem:[%s3155_s6 + $0x10] sm:$0xff]  ;;  %s2575_s26 = smov 32   ;;  %vm1381_vm5 = vcmask 64512   ;;  %vm1608_vm6 = vcmask 1040384  }
  0xd9   : > { %2054 = vmatpush3.bf16.msra.mxu0 %v2053_v6  ;;  %v2074_v15 = vpack.c.bf16 %v819_v12, %v818_v11  ;;  %v575_v16 = vld [vmem:[%s3155_s6] sm:$0xff]  ;;  %v576_v17 = vld [vmem:[%s3155_s6 + $0x8] sm:$0xff]  ;;  %v578_v24 = vld [vmem:[%s3155_s6 + $0x18] sm:$0xff]  ;;  %s2576_s25 = smov 64   ;;  %vm1629_vm7 = vcmask 523264   ;;  %s1849_s19 = sshll.u32 %s2692_s0, 4 }
  0xda   : > { %2072 = vmatpush3.bf16.msra.mxu1 %v2071_v10  ;;  %2055 = vmatprep.subr.bf16.mxu0 %v2572_v5  ;;  %v1827_v18 = vld [vmem:[%s3155_s6 + $0x20] sm:$0xff]  ;;  %v1828_v19 = vld [vmem:[%s3155_s6 + $0x28] sm:$0xff]  ;;  %v2059_v21 = vpack.c.bf16 %v576_v17, %v575_v16  ;;  %v1829_v25 = vld [vmem:[%s3155_s6 + $0x30] sm:$0xff]  ;;  %v2062_v27 = vpack.c.bf16 %v578_v24, %v577_v23  ;;  %vm1631_vm8 = vcmask 588800   ;;  %s3207_s2 = sld [smem:[#allocation36_spill]]  ;;  %s1642_s27 = scalar_lea.sflag [#allocation19], %s2882_s24 }
  0xdb   : > { %2073 = vmatprep.subr.bf16.mxu1 %v2572_v5  ;;  %v2915_v20 = vld [vmem:[#allocation3] sm:$0x1]  ;;  %v2077_v22 = vpack.c.bf16 %v1828_v19, %v1827_v18  ;;  %v1830_v26 = vld [vmem:[%s3155_s6 + $0x38] sm:$0xff]  ;;  %v732_v29 = vld [vmem:[#allocation14] sm:$0xff]  ;;  %p3208_p11 = scmp.ne.s32.totalorder %s3187_s22, 0 }
  0xdc   : > { %v2080_v28 = vpack.c.bf16 %v1830_v26, %v1829_v25  ;;  %v733_v30 = vld [vmem:[#allocation14 + $0x8] sm:$0xff]  ;;  %v964_v31 = vld [vmem:[#allocation14 + $0x20] sm:$0xff]  ;;  %v572_v33 = vld [vmem:[%s561_s15] sm:$0x1]  ;;  %s1667_s15 = sshll.u32 %s557_s28, 4  ;;  %s3071_s15 = int_to_ptr.vmem [resolvable:$true] %s1667_s15 }
  0xdd   : > { %2057 = vmatpush3.bf16.msra.mxu0 %v2056_v14  ;;  %v965_v32 = vld [vmem:[#allocation14 + $0x28] sm:$0xff]  ;;  %v2065_v34 = vpack.c.bf16 %v733_v30, %v732_v29  ;;  %v734_v36 = vld [vmem:[#allocation14 + $0x10] sm:$0xff]  ;;  %v735_v37 = vld [vmem:[#allocation14 + $0x18] sm:$0xff]  ;;  %s2447_s14 = scalar_lea.vmem %s3071_s15, 16 }
  0xde   : > { %2075 = vmatpush3.bf16.msra.mxu1 %v2074_v15  ;;  %2058 = vmatprep.subr.bf16.mxu0 %v2572_v5  ;;  %v2083_v35 = vpack.c.bf16 %v965_v32, %v964_v31  ;;  %v966_v38 = vld [vmem:[#allocation14 + $0x30] sm:$0xff]  ;;  %v967_v39 = vld [vmem:[#allocation14 + $0x38] sm:$0xff]  ;;  %v2068_v40 = vpack.c.bf16 %v735_v37, %v734_v36  ;;  %v1046_v42 = vld [vmem:[#allocation12 + $0x40] sm:$0xff]  ;;  %p2448_p10 = scmp.ne.s32.totalorder %s3071_s15, %s2447_s14 }
  0xdf   : > { %2076 = vmatprep.subr.bf16.mxu1 %v2572_v5  ;;  %v2086_v41 = vpack.c.bf16 %v967_v39, %v966_v38  ;;  %v1047_v43 = vld [vmem:[#allocation12 + $0x48] sm:$0xff]  ;;  %v1835_v44 = vld [vmem:[%s3155_s6 + $0x40] sm:$0xff]  ;;  %v1836_v45 = vld [vmem:[%s3155_s6 + $0x48] sm:$0xff] }
  0xe0   : > { %1924 = vmatmul.mubr.msk.f32.vlgmr.msra.gmra.mrb[0].mxu0 %vm583_vm2, %v2915_v20  ;;  %v2962_v46 = vld [vmem:[#allocation2] sm:$0x1]  ;;  %v2089_v47 = vpack.c.bf16 %v1047_v43, %v1046_v42  ;;  %v2095_v48 = vpack.c.bf16 %v1836_v45, %v1835_v44  ;;  %v1049_v50 = vld [vmem:[#allocation12 + $0x58] sm:$0xff]  ;;  %v1837_v51 = vld [vmem:[%s3155_s6 + $0x50] sm:$0xff]  ;;  %s3069_s3 = scalar_lea.hbm %s3207_s2, %s1849_s19  ;;  %p2449_p1 = pnand %p2448_p10, %p3208_p11 }
  0xe1   : > { %1957 = vmatmul.mubr.msk.f32.vlgmr.msra.gmra.mrb[0].mxu1 %vm583_vm2, %v2915_v20  ;;  %2060 = vmatpush3.bf16.msra.mxu0 %v2059_v21  ;;  %v1048_v49 = vld [vmem:[#allocation12 + $0x50] sm:$0xff]  ;;  %v1194_v55 = vld [vmem:[#allocation14 + $0x40] sm:$0xff]  ;;  %v1195_v56 = vld [vmem:[#allocation14 + $0x48] sm:$0xff] }
  0xe2   : > { %2078 = vmatpush3.bf16.msra.mxu1 %v2077_v22  ;;  %2061 = vmatprep.subr.bf16.mxu0 %v2572_v5  ;;  %v1838_v52 = vld [vmem:[%s3155_s6 + $0x58] sm:$0xff]  ;;  %v2092_v53 = vpack.c.bf16 %v1049_v50, %v1048_v49  ;;  %v2101_v57 = vpack.c.bf16 %v1195_v56, %v1194_v55  ;;  %v1197_v59 = vld [vmem:[#allocation14 + $0x58] sm:$0xff]  ;;  %v1293_v63 = vld [vmem:[%s3154_s5 + $0x10] sm:$0xff]  ;;  %p2450_p3 = pneg %p2449_p1 }
  0xe3   : > { %2079 = vmatprep.subr.bf16.mxu1 %v2572_v5  ;;  %1934 = vmatprep.mubr.msk.f32.mxu0 %vm2573_vm1, %v2574_v13  ;;  %v2098_v54 = vpack.c.bf16 %v1838_v52, %v1837_v51  ;;  %v1196_v58 = vld [vmem:[#allocation14 + $0x50] sm:$0xff]  ;;  %v1292_v62 = vld [vmem:[%s3154_s5 + $0x8] sm:$0xff]  ;;  %v1199_v29 = vld [vmem:[#allocation15 + $0x2] sm:$0x1] }
  0xe4   : > { %1967 = vmatprep.mubr.msk.f32.mxu1 %vm2573_vm1, %v2574_v13  ;;  %v2104_v60 = vpack.c.bf16 %v1197_v59, %v1196_v58  ;;  %v1291_v61 = vld [vmem:[%s3154_s5] sm:$0xff]  ;;  %v1294_v1 = vld [vmem:[%s3154_s5 + $0x18] sm:$0xff]  ;;  %v736_v4 = vld [vmem:[#allocation15] sm:$0x1] }
  0xe5   : > { %2063 = vmatpush3.bf16.msra.mxu0 %v2062_v27  ;;  %v2107_v0 = vpack.c.bf16 %v1292_v62, %v1291_v61  ;;  %v2110_v2 = vpack.c.bf16 %v1294_v1, %v1293_v63  ;;  %v730_v3 = vld [vmem:[%s3158_s9] sm:$0x1]  ;;  %v1833_v7 = vld [vmem:[%s3158_s9 + $0x1] sm:$0x1]  ;;  %v969_v8 = vld [vmem:[#allocation15 + $0x1] sm:$0x1] }
  0xe6   : > { %2081 = vmatpush3.bf16.msra.mxu1 %v2080_v28  ;;  %2064 = vmatprep.subr.bf16.mxu0 %v2572_v5  ;;  %v2124_v6 = vadd.f32 %v736_v4, %v730_v3  ;;  %v2126_v10 = vadd.f32 %v1833_v7, %v969_v8  ;;  %v1841_v32 = vld [vmem:[%s3158_s9 + $0x2] sm:$0x1]  ;;  %v1380_v51 = vld [vmem:[#allocation11] sm:$0xff]  ;;  %v1462_v56 = vld [vmem:[%s3161_s12 + $0x18] sm:$0xff] }
  0xe7   : > { %2082 = vmatprep.subr.bf16.mxu1 %v2572_v5  ;;  %v1459_v52 = vld [vmem:[%s3161_s12] sm:$0xff]  ;;  %v1458_v1 = vld [vmem:[%s3160_s11 + $0x18] sm:$0xff] }
  0xe8   : > { %1935 = vmatmul.mubr.msk.f32.vlgmr.msra.gmra.mrb[0].mxu0 %vm583_vm2, %v572_v33  ;;  %v1455_v59 = vld [vmem:[%s3160_s11] sm:$0xff] }
  0xe9   : > { %1968 = vmatmul.mubr.msk.f32.vlgmr.msra.gmra.mrb[0].mxu1 %vm583_vm2, %v572_v33  ;;  %2066 = vmatpush3.bf16.msra.mxu0 %v2065_v34 }
  0xea   : > { %2084 = vmatpush3.bf16.msra.mxu1 %v2083_v35  ;;  %2067 = vmatprep.subr.bf16.mxu0 %v2572_v5 }
  0xeb   : > { %2085 = vmatprep.subr.bf16.mxu1 %v2572_v5  ;;  %1945 = vmatprep.mubr.msk.f32.mxu0 %vm2573_vm1, %v2574_v13 }
  0xec   : > { %1978 = vmatprep.mubr.msk.f32.mxu1 %vm2573_vm1, %v2574_v13 }
  0xed   : > { %2069 = vmatpush3.bf16.msra.mxu0 %v2068_v40 }
  0xee   : > { %2087 = vmatpush3.bf16.msra.mxu1 %v2086_v41  ;;  %2088 = vmatprep.subr.bf16.mxu0 %v2572_v5 }
  0xef   : > { %2094 = vmatprep.subr.bf16.mxu1 %v2572_v5 }
  0xf0   : > { %1946 = vmatmul.mubr.msk.f32.vlgmr.msra.gmra.mrb[0].mxu0 %vm583_vm2, %v2962_v46 }
  0xf1   : > { %1979 = vmatmul.mubr.msk.f32.vlgmr.msra.gmra.mrb[0].mxu1 %vm583_vm2, %v2962_v46  ;;  %2090 = vmatpush3.bf16.msra.mxu0 %v2089_v47 }
  0xf2   : > { %2096 = vmatpush3.bf16.msra.mxu1 %v2095_v48  ;;  %2091 = vmatprep.subr.bf16.mxu0 %v2572_v5 }
  0xf3   : > { %2097 = vmatprep.subr.bf16.mxu1 %v2572_v5  ;;  %1989 = vmatprep.mubr.msk.f32.mxu0 %vm2573_vm1, %v2574_v13 }
  0xf4   : > { %2000 = vmatprep.mubr.msk.f32.mxu1 %vm2573_vm1, %v2574_v13 }
  0xf5   : > { %2093 = vmatpush3.bf16.msra.mxu0 %v2092_v53  ;;  %v1460_v53 = vld [vmem:[%s3161_s12 + $0x8] sm:$0xff] }
  0xf6   : > { %2099 = vmatpush3.bf16.msra.mxu1 %v2098_v54  ;;  %2100 = vmatprep.subr.bf16.mxu0 %v2572_v5  ;;  %v1461_v54 = vld [vmem:[%s3161_s12 + $0x10] sm:$0xff]  ;;  %v2113_v55 = vpack.c.bf16 %v1460_v53, %v1459_v52 }
  0xf7   : > { %2106 = vmatprep.subr.bf16.mxu1 %v2572_v5 }
  0xf8   : > { %1990 = vmatmul.mubr.msk.f32.vlgmr.msra.gmra.mrb[2].mxu0 %vm583_vm2, %v2915_v20 }
  0xf9   : > { %2102 = vmatpush3.bf16.msra.mxu0 %v2101_v57  ;;  %2001 = vmatmul.mubr.msk.f32.vlgmr.msra.gmra.mrb[2].mxu1 %vm583_vm2, %v572_v33  ;;  %v2116_v57 = vpack.c.bf16 %v1462_v56, %v1461_v54 }
  0xfa   : > { %2103 = vmatprep.subr.bf16.mxu0 %v2572_v5  ;;  %2011 = vmatprep.mubr.msk.f32.mxu0 %vm2573_vm1, %v2574_v13 }
  0xfb   : > { %2022 = vmatprep.mubr.msk.f32.mxu1 %vm2573_vm1, %v2574_v13  ;;  %2108 = vmatpush3.bf16.msra.mxu1 %v2107_v0  ;;  %v1457_v0 = vld [vmem:[%s3160_s11 + $0x10] sm:$0xff] }
  0xfc   : > { %2109 = vmatprep.subr.bf16.mxu1 %v2572_v5 }
  0xfd   : > { %2105 = vmatpush3.bf16.msra.mxu0 %v2104_v60  ;;  %v1456_v60 = vld [vmem:[%s3160_s11 + $0x8] sm:$0xff] }
  0xfe   : > { %2025 = vmatprep.subr.mxu0 %v2574_v13  ;;  %v2119_v62 = vpack.c.bf16 %v1456_v60, %v1455_v59 }
  0xff   : > { %2111 = vmatpush3.bf16.msra.mxu1 %v2110_v2  ;;  %v2122_v2 = vpack.c.bf16 %v1458_v1, %v1457_v0 }
 0x100   : > { %2012 = vmatmul.mubr.msk.f32.vlgmr.msra.gmra.mrb[4].mxu0 %vm583_vm2, %v2962_v46  ;;  %2112 = vmatprep.subr.bf16.mxu1 %v2572_v5 }
 0x101   : > { %2027 = vmatprep.mubr.msk.f32.mxu0 %vm2573_vm1, %v2574_v13  ;;  %2026 = vmatpush3.msra.mxu0 %v1380_v51 }
 0x102   : > { %2118 = vmatprep.subr.bf16.mxu0 %v2572_v5 }
 0x1c3   : > { %v806_v9 = vpop.f32.mrb[0].mxu0 }
 0x1c4   : > { %v2125_v11 = vadd.f32 %v2124_v6, %v806_v9  ;;  %v1036_v12 = vpop.f32.mrb[0].mxu1  ;;  %v1947_v14 = vpop.f32.mrb[1].mxu0  ;;  %v1606_v9 = vld [vmem:[%s3162_s13] sm:$0x1] }
 0x1c5   : > { %v1980_v15 = vpop.f32.mrb[1].mxu1  ;;  %v2127_v17 = vadd.f32 %v2126_v10, %v1036_v12 }
 0x1c6   : > { %v1843_v16 = vmul.f32 -1.442695, %v2125_v11 }
 0x1c7   : > { %v1844_v18 = vmul.f32 -1.442695, %v2127_v17 }
 0x1c8   : > { %2251 = vpow2.f32 %v1843_v16 }
 0x1c9   : > { %2253 = vpow2.f32 %v1844_v18 }
 0x1cb   : > { %v1116_v19 = vpop.f32.mrb[2].mxu0 }
 0x1cc   : > { %v1991_v20 = vpop.f32.mrb[3].mxu0  ;;  %v1186_v21 = vpop.f32.mrb[2].mxu1 }
 0x1cd   : > { %v1187_v22 = vadd.f32 %v1186_v21, %v1116_v19  ;;  %v2002_v23 = vpop.f32.mrb[3].mxu1 }
 0x1cf   : > { %v1192_v34 = vadd.f32 %v1841_v32, %v1187_v22 }
 0x1d2   : > { %v2252_v24 = vpop.eup %2251 }
 0x1d3   : > { %v1274_v25 = vadd.f32 1.0, %v2252_v24  ;;  %v1266_v26 = vpop.f32.mrb[4].mxu0  ;;  %v2254_v28 = vpop.eup %2253 }
 0x1d4   : > { %v2013_v27 = vpop.f32.mrb[5].mxu0  ;;  %v1281_v30 = vadd.f32 1.0, %v2254_v28  ;;  %v1267_v31 = vadd.f32 %v1266_v26, %v1199_v29 }
 0x1d5   : > { %2255 = vrcp.f32 %v1274_v25 }
 0x1d6   : > { %2257 = vrcp.f32 %v1281_v30 }
 0x1df   : > { %v2256_v33 = vpop.eup %2255 }
 0x1e0   : > { %v1284_v35 = vmul.f32 %v2256_v33, %v1267_v31  ;;  %v2258_v37 = vpop.eup %2257 }
 0x1e1   : > { %v1287_v38 = vsub.f32 1.0, %v2258_v37  ;;  %v1289_v41 = vmul.f32 %v2258_v37, %v2962_v46 }
 0x1e2   : > { %v1285_v36 = vadd.f32 %v1284_v35, %v1192_v34 }
 0x1e4   : > { %2259 = vtanh.f32 %v1285_v36 }
 0x1ee   : > { %v2260_v39 = vpop.eup %2259 }
 0x1ef   : > { %v1288_v40 = vmul.f32 %v2260_v39, %v1287_v38 }
 0x1f1   : > { %v1290_v42 = vadd.f32 %v1289_v41, %v1288_v40 }
 0x1f3   : > { %2023 = vmatmul.mubr.msk.f32.vlgmr.msra.gmra.mrb[4].mxu1 %vm583_vm2, %v1290_v42  ;;  %1635 = vst.msk [vmem:[#allocation2] sm:$0x1] %vm1634_vm3, %v1290_v42 }
 0x1f4   : > { %2038 = vmatprep.mubr.msk.f32.mxu1 %vm2573_vm1, %v2574_v13  ;;  %2114 = vmatpush3.bf16.msra.mxu1 %v2113_v55 }
 0x1f5   : > { %2115 = vmatprep.subr.bf16.mxu1 %v2572_v5 }
 0x1f8   : > { %2117 = vmatpush3.bf16.msra.mxu1 %v2116_v57 }
 0x2c6   : > { %v1364_v43 = vpop.f32.mrb[4].mxu1 }
 0x2c7   : > { %v2024_v44 = vpop.f32.mrb[5].mxu1  ;;  %v1369_v45 = vsel %vm1368_vm4, %v1364_v43, -inf }
 0x2c8   : > { %1370 = vmax.xlane.f32.xlu0 %v1369_v45 }
 0x355   : > { %v1371_v47 = vpop.xlane.xlu0 %1370 }
 0x356   : > { %v1372_v48 = vsub.f32 %v1364_v43, %v1371_v47 }
 0x358   : > { %v1373_v49 = vmul.f32 1.442695, %v1372_v48 }
 0x35a   : > { %2261 = vpow2.f32 %v1373_v49 }
 0x364   : > { %v2262_v50 = vpop.eup %2261 }
 0x365   : > { %v1375_v46 = vsel %vm1368_vm4, %v2262_v50, 0.0 }
 0x366   : > { %1376 = vadd.xlane.f32.xlu0 %v1375_v46 }
 0x37c   : > { %1622 = vrot.lane.b32.xlu0 %v1290_v42, %s2575_s26  ;;  %s2577_s26 = smov [#allocation18]  }
 0x37d   : > { %s2451_s18 = sshll.u32 %s2577_s26, 4  ;;  %s2452_s18 = int_to_ptr.vmem [resolvable:$false] %s2451_s18 }
 0x37e   : > { %s2453_s17 = scalar_lea.vmem %s2452_s18, 32  ;;  %p2454_p4 = scmp.lt.s32.totalorder %s3071_s15, %s2452_s18 }
 0x37f   : > { %p2455_p5 = scmp.lt.s32.totalorder %s2453_s17, %s2447_s14 }
 0x381   : > { %p2456_p9 = por %p2455_p5, %p2454_p4 }
 0x383   : > { %p2457_p8 = pnand %p2456_p9, %p2450_p3 }
 0x3f3   : > { %v1377_v58 = vpop.xlane.xlu0 %1376 }
 0x3f4   : > { %2263 = vrcp.f32 %v1377_v58 }
 0x3f7   : > { %v1623_v19 = vpop.permute.xlu0 %1622 }
 0x3fe   : > { %v2264_v61 = vpop.eup %2263 }
 0x3ff   : > { %v1379_v63 = vmul.f32 %v2264_v61, %v2262_v50 }
 0x401   : > { %2028 = vmatmul.mubr.msk.f32.vlgmr.msra.gmra.mrb[6].mxu0 %vm1381_vm5, %v1379_v63 }
 0x402   : > { %2120 = vmatpush3.bf16.msra.mxu0 %v2119_v62  ;;  %2049 = vmatprep.mubr.msk.f32.mxu0 %vm2573_vm1, %v2574_v13 }
 0x403   : > { %2121 = vmatprep.subr.bf16.mxu0 %v2572_v5 }
 0x406   : > { %2123 = vmatpush3.bf16.msra.mxu0 %v2122_v2 }
 0x409   : > { %2050 = vmatmul.mubr.msk.f32.vlgmr.msra.gmra.mrb[8].mxu0 %vm583_vm2, %v1290_v42 }
 0x4d4   : > { %v1451_v3 = vpop.f32.mrb[6].mxu0 }
 0x4d5   : > { %1636 = vst.msk [vmem:[#allocation3] sm:$0x1] %vm1634_vm3, %v1451_v3  ;;  %v2029_v4 = vpop.f32.mrb[7].mxu0  ;;  %2039 = vmatmul.mubr.msk.f32.vlgmr.msra.gmra.mrb[6].mxu1 %vm583_vm2, %v1451_v3  ;;  %v1628_v20 = vsel %vm583_vm2, %v1451_v3, %v1623_v19 }
 0x4dc   : > { %v1602_v6 = vpop.f32.mrb[8].mxu0 }
 0x4dd   : > { %v2051_v7 = vpop.f32.mrb[9].mxu0 }
 0x5a8   : > { %v1532_v8 = vpop.f32.mrb[6].mxu1 }
 0x5a9   : > { %v1603_v10 = vadd.f32 %v1602_v6, %v1532_v8  ;;  %v2040_v13 = vpop.f32.mrb[7].mxu1 }
 0x5ab   : > { %v1607_v5 = vadd.f32 %v1606_v9, %v1603_v10 }
 0x5ad   : > { %v1609_v11 = vsel %vm1608_vm6, %v1607_v5, -inf }
 0x5ae   : > { %1610 = vmax.xlane.f32.xlu1 %v1609_v11 }
 0x63b   : > { %v1611_v12 = vpop.xlane.xlu1 %1610 }
 0x63c   : > { %v1612_v14 = vsub.f32 %v1607_v5, %v1611_v12 }
 0x63e   : > { %v1613_v15 = vmul.f32 1.442695, %v1612_v14 }
 0x640   : > { %2265 = vpow2.f32 %v1613_v15 }
 0x64a   : > { %v2266_v16 = vpop.eup %2265 }
 0x64b   : > { %v1615_v17 = vsel %vm1608_vm6, %v2266_v16, 0.0 }
 0x64c   : > { %1616 = vadd.xlane.f32.xlu1 %v1615_v17 }
 0x65d   : > { %1625 = vrot.lane.b32.xlu1 %v1379_v63, %s2576_s25 }
 0x6d9   : > { %v1617_v18 = vpop.xlane.xlu1 %1616 }
 0x6da   : > { %2267 = vlog2.f32 %v1617_v18 }
 0x6dd   : > { %v1626_v21 = vpop.permute.xlu1 %1625 }
 0x6de   : > { %v1630_v22 = vsel %vm1629_vm7, %v1628_v20, %v1626_v21 }
 0x6df   : > { %v1632_v23 = vsel %vm1631_vm8, %v1630_v22, 0.0 }
 0x6e0   : > { %1633 = vst [vmem:[%s557_s28] sm:$0x1] %v1632_v23 }
 0x6e1   : > { %2460 = shalt.err (!%p2457_p8)
}
 0x6e2   : > { %s2461_s28 = scalar_lea.hbm %s3069_s3, 16  ;;  %s2465_s25 = scalar_lea.hbm %s3207_s2, 96 }
 0x6e3   : > { %p2462_p12 = scmp.ne.s32.totalorder %s3069_s3, %s2461_s28  ;;  %p2466_p0 = scmp.lt.u32.totalorder %s3069_s3, %s3207_s2 }
 0x6e4   : > { %p2467_p6 = scmp.lt.u32.totalorder %s2465_s25, %s2461_s28  ;;  %p2469_p10 = scmp.lt.u32.totalorder %s2461_s28, %s3069_s3 }
 0x6e5   : > { %p2463_p2 = pnand %p2462_p12, %p3208_p11 }
 0x6e6   : > { %p2468_p7 = por %p2467_p6, %p2466_p0 }
 0x6e7   : > { %p2464_p13 = pneg %p2463_p2 }
 0x6e8   : > { %p2470_p1 = por %p2469_p10, %p2468_p7 }
 0x6ea   : > { %p2471_p3 = pnand %p2470_p1, %p2464_p13 }
 0x6ec   : > { %2474 = shalt.err (!%p2471_p3)
}
 0x6ed   : > { %2161 = dma.vmem_to_hbm [thread:$0]  (%p3208_p11), %s3071_s15, 16, %s3069_s3, %s1642_s27   ;;  %v2268_v24 = vpop.eup %2267 }
 0x6ee   : > { %s1654_s14 = sshll.u32 %s551_s20, 4  ;;  %v1619_v25 = vmul.f32 0.6931472, %v2268_v24  ;;  %s3209_s17 = sld [smem:[#allocation35_spill]]  ;;  %s3106_s14 = int_to_ptr.vmem [resolvable:$true] %s1654_s14 }
 0x6ef   : > { %s1638_s23 = scalar_lea.sflag [#allocation8], %s2882_s24  ;;  %s2475_s15 = scalar_lea.vmem %s3106_s14, 16 }
 0x6f0   : > { %v1620_v26 = vsub.f32 %v1612_v14, %v1619_v25  ;;  %p2476_p4 = scmp.ne.s32.totalorder %s3106_s14, %s2475_s15  ;;  %s2578_s3 = smov [#allocation17]  }
 0x6f1   : > { %s2479_s0 = sshll.u32 %s2578_s3, 4  ;;  %s2480_s0 = int_to_ptr.vmem [resolvable:$false] %s2479_s0 }
 0x6f2   : > { %1621 = vst [vmem:[%s551_s20] sm:$0x1] %v1620_v26  ;;  %p2477_p5 = pnand %p2476_p4, %p3208_p11  ;;  %s2481_s27 = scalar_lea.vmem %s2480_s0, 32 }
 0x6f3   : > { %p2482_p8 = scmp.lt.s32.totalorder %s3106_s14, %s2480_s0  ;;  %p2483_p12 = scmp.lt.s32.totalorder %s2481_s27, %s2475_s15 }
 0x6f4   : > { %s3104_s28 = scalar_lea.hbm %s3209_s17, %s1849_s19  ;;  %p2478_p9 = pneg %p2477_p5 }
 0x6f5   : > { %p2484_p2 = por %p2483_p12, %p2482_p8 }
 0x6f7   : > { %p2485_p13 = pnand %p2484_p2, %p2478_p9 }
 0x6f9   : > { %2488 = shalt.err (!%p2485_p13)
}
 0x6fa   : > { %s2489_s24 = scalar_lea.hbm %s3104_s28, 16  ;;  %s2493_s30 = scalar_lea.hbm %s3209_s17, 96 }
 0x6fb   : > { %p2490_p0 = scmp.ne.s32.totalorder %s3104_s28, %s2489_s24  ;;  %p2494_p10 = scmp.lt.u32.totalorder %s3104_s28, %s3209_s17 }
 0x6fc   : > { %p2495_p1 = scmp.lt.u32.totalorder %s2493_s30, %s2489_s24  ;;  %p2497_p4 = scmp.lt.u32.totalorder %s2489_s24, %s3104_s28 }
 0x6fd   : > { %p2491_p6 = pnand %p2490_p0, %p3208_p11 }
 0x6fe   : > { %p2496_p3 = por %p2495_p1, %p2494_p10 }
 0x6ff   : > { %p2492_p7 = pneg %p2491_p6 }
 0x700   : > { %p2498_p5 = por %p2497_p4, %p2496_p3 }
 0x702   : > { %p2499_p9 = pnand %p2498_p5, %p2492_p7 }
 0x704   : > { %2502 = shalt.err (!%p2499_p9)
}
 0x705   : > { %2160 = dma.vmem_to_hbm [thread:$0]  (%p3208_p11), %s3106_s14, 16, %s3104_s28, %s1638_s23  }
 0x706 PF: > { %s3210_s16 = sld [smem:[#allocation29_spill]]  ;;  %s3211_s26 = sld [smem:[#allocation27_spill]] }
 0x707   : > { %s3212_s18 = sld [smem:[#allocation32_spill]] }
 0x70c   : > { %p2202_p8 = scmp.ge.s32.totalorder %s3210_s16, 2  ;;  %s1679_s15 = sand.u32 1, %s3211_s26  }
 0x70d   : > { %p3213_p12 = scmp.ne.s32.totalorder %s3212_s18, 0  ;;  %s1680_s3 = scalar_lea.sflag [#allocation8], %s1679_s15 }
 0x70f   : > { %p2184_p2 = pnand %p2202_p8, %p3213_p12 }
 0x711   : > { %2538 = dma.done.wait (!%p2184_p2), %s1680_s3, 16  }
 0x712   : > { %2540 = vsyncadd (!%p2184_p2), %s1680_s3, 4294967280  ;;  %s1688_s0 = scalar_lea.sflag [#allocation19], %s1679_s15 }
 0x713   : > { %2542 = dma.done.wait (!%p2184_p2), %s1688_s0, 16  }
 0x714   : > { %2544 = vsyncadd (!%p2184_p2), %s1688_s0, 4294967280  ;;  %s3214_s16 = sld [smem:[#allocation30_spill]]  ;;  %s3215_s22 = sld [smem:[#allocation28_spill]] }
 0x715   : > { %s3216_s30 = sld [smem:[#allocation31_spill]]  ;;  %s3217_s28 = smov %s2551_s29 }
 0x71a   : > { %p37_p11 = scmp.ge.s32.totalorder %s3214_s16, 8   ;;  %s3218_s29 = smov %s3215_s22 }
 0x71c   :  { %39 = sbr.rel (!%p37_p11) target bundleno = 22 (0x16), region = 163 }
 0x723   :  { %1692 = vsyncpa [#allocation7], 1 }
 0x724   :  { %1694 = vsyncpa [#allocation7 + $0x1], 1 }
 0x725   :  { %1695 = vsyncpa [#allocation10], 1 }
 0x726   :  { %1696 = vsyncpa [#allocation13], 1 }
 0x727   :  { %1697 = vsyncpa [#allocation16], 1 }
 0x728   :  { %1698 = vsyncpa [#allocation8], 1 }
 0x729   :  { %1700 = vsyncpa [#allocation8 + $0x1], 1 }
 0x72a   :  { %1701 = vsyncpa [#allocation19], 1 }
 0x72b   :  { %1703 = vsyncpa [#allocation19 + $0x1], 1 }

</bundles_post_ra>
